<compile_context>
chip_gen: v6e
topology: v6e:2x2x1
jax: 0.10.0
libtpu: 0.0.40
codegen_flags: <defaults>
</compile_context>

<pallas_src>
import math
import functools

import jax
import jax.numpy as jnp
from jax import lax
from jax.experimental import pallas as pl
from jax.experimental.pallas import tpu as pltpu

LN_EPS = 1e-5  # torch nn.LayerNorm default
_MiB = 1024 * 1024


def _layernorm(y, gamma, beta):
    # f32 statistics; rsqrt lowers to the EUP (free slot vs VALU).
    mean = jnp.mean(y, axis=-1, keepdims=True)
    var = jnp.mean((y - mean) ** 2, axis=-1, keepdims=True)
    return (y - mean) * lax.rsqrt(var + LN_EPS) * gamma + beta


def transformer_layer_kernel(x_ref,
                             wq_ref, bq_ref, wk_ref, bk_ref, wv_ref, bv_ref,
                             wo_ref, bo_ref, g1_ref, be1_ref,
                             w1_ref, b1_ref, w2_ref, b2_ref, g2_ref, be2_ref,
                             o_ref, oslab_ref, *, head, d_k):
    Bt, L, D = x_ref.shape
    R = Bt * L
    x = x_ref[...].reshape(R, D)                       # f32 residual stream
    xb = x.astype(jnp.bfloat16)
    scale = 1.0 / math.sqrt(d_k)

    # ---------------- Multi-head attention block ----------------
    # QKV projections: bf16 MXU operands, f32 accumulation + bias; cast to bf16
    # ONCE (no f32 q/k/v slabs kept live) and fold 1/sqrt(d_k) into q here so
    # the per-head (Bt, L, L) score tiles are never rescaled on the VALU.
    q = ((jnp.dot(xb, wq_ref[...], preferred_element_type=jnp.float32)
          + bq_ref[...]) * scale).astype(jnp.bfloat16)
    k = (jnp.dot(xb, wk_ref[...], preferred_element_type=jnp.float32)
         + bk_ref[...]).astype(jnp.bfloat16)
    v = (jnp.dot(xb, wv_ref[...], preferred_element_type=jnp.float32)
         + bv_ref[...]).astype(jnp.bfloat16)

    # Per-head attention; each head's output goes into its d_k-wide slice of
    # the bf16 scratch slab so the Wo projection below runs ONCE at full
    # contraction depth D (MXU K-dim fully utilized).
    # TODO(synk): batch all heads into a single (Bt*head, L, d_k) einsum and
    # use an online-softmax / KV-tiled (flash) attention for long L on v7x.
    for h in range(head):                              # static unroll over heads
        sl = slice(h * d_k, (h + 1) * d_k)
        qh = q[:, sl].reshape(Bt, L, d_k)
        kh = k[:, sl].reshape(Bt, L, d_k)
        vh = v[:, sl].reshape(Bt, L, d_k)
        s = jnp.einsum("bld,bmd->blm", qh, kh,
                       preferred_element_type=jnp.float32)      # (Bt, L, L) f32
        s = s - jnp.max(s, axis=-1, keepdims=True)               # f32 softmax stats
        p = jnp.exp(s)
        # approx reciprocal lowers to the EUP; ~1e-3 rel. error vs exact softmax.
        p = p * pl.reciprocal(jnp.sum(p, axis=-1, keepdims=True), approx=True)
        oh = jnp.einsum("blm,bmd->bld", p.astype(jnp.bfloat16), vh,
                        preferred_element_type=jnp.float32)      # (Bt, L, d_k)
        oslab_ref[:, sl] = oh.reshape(R, d_k).astype(jnp.bfloat16)

    # Single full-depth output projection: concat_h(o_h) @ Wo.
    y = jnp.dot(oslab_ref[...], wo_ref[...],
                preferred_element_type=jnp.float32) + bo_ref[...]
    y = _layernorm(y, g1_ref[...], be1_ref[...])
    x = y + x                                          # residual add in f32

    # ---------------- Feed-forward block ----------------
    xb2 = x.astype(jnp.bfloat16)
    hdn = jnp.dot(xb2, w1_ref[...], preferred_element_type=jnp.float32) + b1_ref[...]
    hdn = 0.5 * hdn * (1.0 + lax.erf(hdn * (1.0 / math.sqrt(2.0))))  # exact GELU
    y = jnp.dot(hdn.astype(jnp.bfloat16), w2_ref[...],
                preferred_element_type=jnp.float32) + b2_ref[...]
    y = _layernorm(y, g2_ref[...], be2_ref[...])
    o_ref[...] = (y + x).reshape(Bt, L, D)


def _vmem_capacity_bytes():
    """Physical per-core VMEM; conservative 64 MiB fallback if unqueryable."""
    try:
        info_fn = getattr(pltpu, "get_tpu_info", None)
        if info_fn is None:
            return 64 * _MiB
        cap = getattr(info_fn(), "vmem_capacity_bytes", None)
        return int(cap) if cap else 64 * _MiB
    except Exception:
        return 64 * _MiB


@functools.lru_cache(maxsize=1)
def _single_buffer_supported():
    """Probe once whether pipeline_mode=pl.Buffered(1) lowers on this backend."""
    if not hasattr(pl, "Buffered"):
        return False

    def _copy(x_ref, o_ref):
        o_ref[...] = x_ref[...] + 1.0

    try:
        f = pl.pallas_call(
            _copy,
            out_shape=jax.ShapeDtypeStruct((8, 128), jnp.float32),
            grid=(2,),
            in_specs=[pl.BlockSpec((8, 128), lambda i: (0, 0),
                                   pipeline_mode=pl.Buffered(1))],
            out_specs=pl.BlockSpec((8, 128), lambda i: (0, 0)),
        )
        jax.block_until_ready(f(jnp.zeros((8, 128), jnp.float32)))
        return True
    except Exception:
        return False


def _layer_vmem_bytes(Bt, L, D, H, weight_buffers):
    """Honest per-grid-step VMEM estimate (includes score + MLP hidden slabs)."""
    R = Bt * L
    act_tile = R * D * 4                              # one f32 (Bt, L, D) tile
    weights = (4 * D * D + 2 * D * H) * 2             # bf16 weights
    params = (7 * D + H) * 4                          # biases + LN params (f32)
    interm = (R * D * 20                              # x/y/temp f32 + q/k/v + slab bf16
              + Bt * L * L * 6                        # per-head scores f32 + probs bf16
              + R * H * 6)                            # MLP hidden f32 + bf16 copy
    # x in-tile and out-tile are double-buffered by the pipeline.
    return 2 * 2 * act_tile + weight_buffers * (weights + params) + interm


def _choose_batch_tile(B, L, D, H, target_rows, min_steps, vmem_cap, wbufs):
    """Largest divisor Bt of B that keeps >= min_steps grid steps (when
    possible), stays under target_rows rows and fits the VMEM budget."""
    best = 1
    for bt in range(1, B + 1):
        if B % bt:
            continue
        if bt > 1:
            if B >= min_steps and B // bt < min_steps:
                continue
            if bt * L > target_rows:
                continue
            if 1.15 * _layer_vmem_bytes(bt, L, D, H, wbufs) > vmem_cap:
                continue
        best = bt
    return best


def transformer_layer(x, p, head):
    B, L, D = x.shape
    H = p["w1"].shape[1]
    d_k = D // head

    # ---- generation-aware tile / VMEM policy ----
    vmem_phys = _vmem_capacity_bytes()
    if vmem_phys >= 100 * _MiB:
        # v5e / v6e: 128 MiB VMEM, one TensorCore -> big tiles, no forced split.
        target_rows, min_steps, vmem_cap = 1024, 1, 100 * _MiB
    else:
        # v7x: 64 MiB per TC, two TCs -> keep >= 2 parallel grid steps and
        # leave ~20% headroom below the physical ceiling.
        target_rows, min_steps, vmem_cap = 256, 2, 52 * _MiB

    use_single_buf = _single_buffer_supported()
    wbufs = 1 if use_single_buf else 2
    Bt = _choose_batch_tile(B, L, D, H, target_rows, min_steps, vmem_cap, wbufs)
    grid = (B // Bt,)
    R = Bt * L

    est = _layer_vmem_bytes(Bt, L, D, H, wbufs)
    vmem_limit = int(min(vmem_cap, max(32 * _MiB, 1.3 * est)))

    # Activation tile: only the batch axis is blocked; the last two dims are
    # full extent so the (8, 128) divisibility rule holds for any L, D.
    xspec = pl.BlockSpec((Bt, L, D), lambda b: (b, 0, 0))

    # Grid-invariant parameter specs (constant index_map => one DMA per call);
    # single-buffered when supported so large weights aren't double-buffered.
    def cspec(shape):
        nd = len(shape)
        kwargs = {"pipeline_mode": pl.Buffered(1)} if use_single_buf else {}
        return pl.BlockSpec(shape, lambda b, _nd=nd: (0,) * _nd, **kwargs)

    # ---- advisory cost estimate so XLA can schedule around the custom call ----
    N = B * L
    flops = 8 * N * D * D + 4 * N * D * H + 4 * N * L * D
    transcendentals = B * head * L * L + N * H + 2 * N
    bytes_accessed = 2 * N * D * 4 + (4 * D * D + 2 * D * H) * 2 + (7 * D + H) * 4
    cost = pl.CostEstimate(flops=int(flops), transcendentals=int(transcendentals),
                           bytes_accessed=int(bytes_accessed))

    kern = functools.partial(transformer_layer_kernel, head=head, d_k=d_k)
    return pl.pallas_call(
        kern,
        out_shape=jax.ShapeDtypeStruct((B, L, D), x.dtype),
        grid=grid,
        in_specs=[xspec,
                  cspec((D, D)), cspec((1, D)),   # wq, bq
                  cspec((D, D)), cspec((1, D)),   # wk, bk
                  cspec((D, D)), cspec((1, D)),   # wv, bv
                  cspec((D, D)), cspec((1, D)),   # wo, bo
                  cspec((1, D)), cspec((1, D)),   # gamma1, beta1
                  cspec((D, H)), cspec((1, H)),   # w1, b1
                  cspec((H, D)), cspec((1, D)),   # w2, b2
                  cspec((1, D)), cspec((1, D))],  # gamma2, beta2
        out_specs=xspec,
        scratch_shapes=[pltpu.VMEM((R, D), jnp.bfloat16)],  # head-concat slab
        compiler_params=pltpu.CompilerParams(
            dimension_semantics=("parallel",),
            vmem_limit_bytes=vmem_limit),
        cost_estimate=cost,
    )(x,
      p["wq"], p["bq"], p["wk"], p["bk"], p["wv"], p["bv"], p["wo"], p["bo"],
      p["g1"], p["be1"],
      p["w1"], p["b1"], p["w2"], p["b2"], p["g2"], p["be2"])


def transformer_forward(x, params, head):
    # mask=None path of the torch module; dropout=0.0 -> identity.
    # TODO(synk): prefetch layer i+1 weights across the pallas_call boundary
    # (P10 cross-call DMA futures) or fuse two layers per call to hide the
    # per-layer cold weight fetch (largest remaining latency lever on v5e).
    # TODO(synk): optionally keep the inter-layer residual stream in bf16 and
    # store v7x weights in fp8 (e4m3) with per-channel scales after validation.
    for layer in params:
        x = transformer_layer(x, layer, head)
    return x


def init_params(key, dim, depth, head, mlp_dim):
    assert dim % head == 0
    params = []

    def lin(k, fan_in, fan_out):
        k1, k2 = jax.random.split(k)
        bound = 1.0 / math.sqrt(fan_in)
        w = jax.random.uniform(k1, (fan_in, fan_out), jnp.float32, -bound, bound)
        b = jax.random.uniform(k2, (1, fan_out), jnp.float32, -bound, bound)
        return w.astype(jnp.bfloat16), b             # bf16 weights, f32 biases

    k = key
    for _ in range(depth):
        k, *ks = jax.random.split(k, 7)
        wq, bq = lin(ks[0], dim, dim)
        wk, bk = lin(ks[1], dim, dim)
        wv, bv = lin(ks[2], dim, dim)
        wo, bo = lin(ks[3], dim, dim)
        w1, b1 = lin(ks[4], dim, mlp_dim)
        w2, b2 = lin(ks[5], mlp_dim, dim)
        ones = jnp.ones((1, dim), jnp.float32)
        zeros = jnp.zeros((1, dim), jnp.float32)
        params.append(dict(wq=wq, bq=bq, wk=wk, bk=bk, wv=wv, bv=bv, wo=wo, bo=bo,
                           g1=ones, be1=zeros,
                           w1=w1, b1=b1, w2=w2, b2=b2, g2=ones, be2=zeros))
    return params


def reference_forward(x, params, head):
    # Pure-JAX f32 mirror of the PyTorch forward (mask=None, dropout=0),
    # using the same (bf16-valued) weights cast to f32.
    B, L, D = x.shape
    d_k = D // head
    f32 = lambda a: a.astype(jnp.float32)

    def ln(y, g, b):
        m = jnp.mean(y, -1, keepdims=True)
        v = jnp.mean((y - m) ** 2, -1, keepdims=True)
        return (y - m) / jnp.sqrt(v + LN_EPS) * g + b

    for p in params:
        q = x @ f32(p["wq"]) + p["bq"]
        k = x @ f32(p["wk"]) + p["bk"]
        v = x @ f32(p["wv"]) + p["bv"]
        q = q.reshape(B, L, head, d_k).transpose(0, 2, 1, 3)
        k = k.reshape(B, L, head, d_k).transpose(0, 2, 1, 3)
        v = v.reshape(B, L, head, d_k).transpose(0, 2, 1, 3)
        s = jnp.einsum("bhld,bhmd->bhlm", q, k) / math.sqrt(d_k)
        a = jax.nn.softmax(s, axis=-1)
        o = jnp.einsum("bhlm,bhmd->bhld", a, v).transpose(0, 2, 1, 3).reshape(B, L, D)
        y = o @ f32(p["wo"]) + p["bo"]
        x = ln(y, p["g1"], p["be1"]) + x

        h = x @ f32(p["w1"]) + p["b1"]
        h = 0.5 * h * (1.0 + lax.erf(h / math.sqrt(2.0)))
        y = h @ f32(p["w2"]) + p["b2"]
        x = ln(y, p["g2"], p["be2"]) + x
    return x


if __name__ == "__main__":
    # Small shapes consistent with the module: dim % head == 0.
    B, L, D = 2, 8, 64
    HEAD, DEPTH, MLP_DIM = 4, 2, 128

    key = jax.random.PRNGKey(0)
    kx, kp = jax.random.split(key)
    x = jax.random.normal(kx, (B, L, D), dtype=jnp.float32)
    params = init_params(kp, D, DEPTH, HEAD, MLP_DIM)

    fwd = jax.jit(functools.partial(transformer_forward, head=HEAD))
    out = jax.block_until_ready(fwd(x, params))

    ref = reference_forward(x, params, HEAD)
    err = float(jnp.max(jnp.abs(out - ref)))
    assert out.shape == (B, L, D)
    # bf16 MXU operands + approx softmax reciprocal => slightly relaxed tolerance.
    assert err < 5e-2, f"max abs error vs reference too large: {err}"

    print("KERNEL_OK")
</pallas_src>

<mosaic_0001>
module attributes {stable_mosaic.version = 11 : i64} {
  func.func @transformer_layer_kernel(%arg0: i32, %arg1: memref<1x8x64xf32, #tpu.memory_space<vmem>>, %arg2: memref<64x64xbf16, #tpu.memory_space<vmem>>, %arg3: memref<1x64xf32, #tpu.memory_space<vmem>>, %arg4: memref<64x64xbf16, #tpu.memory_space<vmem>>, %arg5: memref<1x64xf32, #tpu.memory_space<vmem>>, %arg6: memref<64x64xbf16, #tpu.memory_space<vmem>>, %arg7: memref<1x64xf32, #tpu.memory_space<vmem>>, %arg8: memref<64x64xbf16, #tpu.memory_space<vmem>>, %arg9: memref<1x64xf32, #tpu.memory_space<vmem>>, %arg10: memref<1x64xf32, #tpu.memory_space<vmem>>, %arg11: memref<1x64xf32, #tpu.memory_space<vmem>>, %arg12: memref<64x128xbf16, #tpu.memory_space<vmem>>, %arg13: memref<1x128xf32, #tpu.memory_space<vmem>>, %arg14: memref<128x64xbf16, #tpu.memory_space<vmem>>, %arg15: memref<1x64xf32, #tpu.memory_space<vmem>>, %arg16: memref<1x64xf32, #tpu.memory_space<vmem>>, %arg17: memref<1x64xf32, #tpu.memory_space<vmem>>, %arg18: memref<1x8x64xf32, #tpu.memory_space<vmem>>, %arg19: memref<8x64xbf16, #tpu.memory_space<vmem>>) attributes {dimension_semantics = [#tpu.dimension_semantics<parallel>], iteration_bounds = array<i64: 2>, scalar_prefetch = 0 : i64, scratch_operands = 1 : i64, tpu.core_type = #tpu.core_type<tc>, window_params = [{transform_indices = @transform_0, window_bounds = array<i64: 1, 8, 64>}, {pipeline_mode = #tpu.pipeline_mode<synchronous>, transform_indices = @transform_1, window_bounds = array<i64: 64, 64>}, {pipeline_mode = #tpu.pipeline_mode<synchronous>, transform_indices = @transform_2, window_bounds = array<i64: 1, 64>}, {pipeline_mode = #tpu.pipeline_mode<synchronous>, transform_indices = @transform_3, window_bounds = array<i64: 64, 64>}, {pipeline_mode = #tpu.pipeline_mode<synchronous>, transform_indices = @transform_4, window_bounds = array<i64: 1, 64>}, {pipeline_mode = #tpu.pipeline_mode<synchronous>, transform_indices = @transform_5, window_bounds = array<i64: 64, 64>}, {pipeline_mode = #tpu.pipeline_mode<synchronous>, transform_indices = @transform_6, window_bounds = array<i64: 1, 64>}, {pipeline_mode = #tpu.pipeline_mode<synchronous>, transform_indices = @transform_7, window_bounds = array<i64: 64, 64>}, {pipeline_mode = #tpu.pipeline_mode<synchronous>, transform_indices = @transform_8, window_bounds = array<i64: 1, 64>}, {pipeline_mode = #tpu.pipeline_mode<synchronous>, transform_indices = @transform_9, window_bounds = array<i64: 1, 64>}, {pipeline_mode = #tpu.pipeline_mode<synchronous>, transform_indices = @transform_10, window_bounds = array<i64: 1, 64>}, {pipeline_mode = #tpu.pipeline_mode<synchronous>, transform_indices = @transform_11, window_bounds = array<i64: 64, 128>}, {pipeline_mode = #tpu.pipeline_mode<synchronous>, transform_indices = @transform_12, window_bounds = array<i64: 1, 128>}, {pipeline_mode = #tpu.pipeline_mode<synchronous>, transform_indices = @transform_13, window_bounds = array<i64: 128, 64>}, {pipeline_mode = #tpu.pipeline_mode<synchronous>, transform_indices = @transform_14, window_bounds = array<i64: 1, 64>}, {pipeline_mode = #tpu.pipeline_mode<synchronous>, transform_indices = @transform_15, window_bounds = array<i64: 1, 64>}, {pipeline_mode = #tpu.pipeline_mode<synchronous>, transform_indices = @transform_16, window_bounds = array<i64: 1, 64>}, {transform_indices = @transform_17, window_bounds = array<i64: 1, 8, 64>}]} {
    %c0 = arith.constant 0 : index
    %c0_0 = arith.constant 0 : index
    %c0_1 = arith.constant 0 : index
    %0 = vector.load %arg1[%c0, %c0_0, %c0_1] : memref<1x8x64xf32, #tpu.memory_space<vmem>>, vector<1x8x64xf32>
    %1 = vector.shape_cast %0 : vector<1x8x64xf32> to vector<8x64xf32>
    %2 = arith.truncf %1 : vector<8x64xf32> to vector<8x64xbf16>
    %c0_2 = arith.constant 0 : index
    %c0_3 = arith.constant 0 : index
    %3 = vector.load %arg2[%c0_2, %c0_3] : memref<64x64xbf16, #tpu.memory_space<vmem>>, vector<64x64xbf16>
    %cst = arith.constant dense<0.000000e+00> : vector<8x64xf32>
    %4 = tpu.matmul %2, %3, %cst {dimension_numbers = #tpu.dot_dimension_numbers<[1], [0], [0], [1], [0, 0, 1, 1], [], []>} : vector<8x64xbf16>, vector<64x64xbf16>, vector<8x64xf32> -> vector<8x64xf32>
    %c0_4 = arith.constant 0 : index
    %c0_5 = arith.constant 0 : index
    %5 = vector.load %arg3[%c0_4, %c0_5] : memref<1x64xf32, #tpu.memory_space<vmem>>, vector<1x64xf32>
    %6 = vector.broadcast %5 : vector<1x64xf32> to vector<8x64xf32>
    %7 = arith.addf %4, %6 : vector<8x64xf32>
    %cst_6 = arith.constant 2.500000e-01 : f32
    %8 = vector.broadcast %cst_6 : f32 to vector<8x64xf32>
    %9 = arith.mulf %7, %8 : vector<8x64xf32>
    %10 = arith.truncf %9 : vector<8x64xf32> to vector<8x64xbf16>
    %c0_7 = arith.constant 0 : index
    %c0_8 = arith.constant 0 : index
    %11 = vector.load %arg4[%c0_7, %c0_8] : memref<64x64xbf16, #tpu.memory_space<vmem>>, vector<64x64xbf16>
    %cst_9 = arith.constant dense<0.000000e+00> : vector<8x64xf32>
    %12 = tpu.matmul %2, %11, %cst_9 {dimension_numbers = #tpu.dot_dimension_numbers<[1], [0], [0], [1], [0, 0, 1, 1], [], []>} : vector<8x64xbf16>, vector<64x64xbf16>, vector<8x64xf32> -> vector<8x64xf32>
    %c0_10 = arith.constant 0 : index
    %c0_11 = arith.constant 0 : index
    %13 = vector.load %arg5[%c0_10, %c0_11] : memref<1x64xf32, #tpu.memory_space<vmem>>, vector<1x64xf32>
    %14 = vector.broadcast %13 : vector<1x64xf32> to vector<8x64xf32>
    %15 = arith.addf %12, %14 : vector<8x64xf32>
    %16 = arith.truncf %15 : vector<8x64xf32> to vector<8x64xbf16>
    %c0_12 = arith.constant 0 : index
    %c0_13 = arith.constant 0 : index
    %17 = vector.load %arg6[%c0_12, %c0_13] : memref<64x64xbf16, #tpu.memory_space<vmem>>, vector<64x64xbf16>
    %cst_14 = arith.constant dense<0.000000e+00> : vector<8x64xf32>
    %18 = tpu.matmul %2, %17, %cst_14 {dimension_numbers = #tpu.dot_dimension_numbers<[1], [0], [0], [1], [0, 0, 1, 1], [], []>} : vector<8x64xbf16>, vector<64x64xbf16>, vector<8x64xf32> -> vector<8x64xf32>
    %c0_15 = arith.constant 0 : index
    %c0_16 = arith.constant 0 : index
    %19 = vector.load %arg7[%c0_15, %c0_16] : memref<1x64xf32, #tpu.memory_space<vmem>>, vector<1x64xf32>
    %20 = vector.broadcast %19 : vector<1x64xf32> to vector<8x64xf32>
    %21 = arith.addf %18, %20 : vector<8x64xf32>
    %22 = arith.truncf %21 : vector<8x64xf32> to vector<8x64xbf16>
    %23 = vector.extract_strided_slice %10 {offsets = [0, 0], sizes = [8, 16], strides = [1, 1]} : vector<8x64xbf16> to vector<8x16xbf16>
    %24 = vector.shape_cast %23 : vector<8x16xbf16> to vector<1x8x16xbf16>
    %25 = vector.extract_strided_slice %16 {offsets = [0, 0], sizes = [8, 16], strides = [1, 1]} : vector<8x64xbf16> to vector<8x16xbf16>
    %26 = vector.shape_cast %25 : vector<8x16xbf16> to vector<1x8x16xbf16>
    %27 = vector.extract_strided_slice %22 {offsets = [0, 0], sizes = [8, 16], strides = [1, 1]} : vector<8x64xbf16> to vector<8x16xbf16>
    %28 = vector.shape_cast %27 : vector<8x16xbf16> to vector<1x8x16xbf16>
    "tpu.trace_start"() <{level = 10 : i32, message = "bld,bmd->blm"}> : () -> ()
    %cst_17 = arith.constant dense<0.000000e+00> : vector<1x8x8xf32>
    %29 = tpu.matmul %24, %26, %cst_17 {dimension_numbers = #tpu.dot_dimension_numbers<[2], [2], [1], [1], [0, 0, 0, 1, 1, 1], [0], [0]>} : vector<1x8x16xbf16>, vector<1x8x16xbf16>, vector<1x8x8xf32> -> vector<1x8x8xf32>
    "tpu.trace_stop"() : () -> ()
    %cst_18 = arith.constant dense<0xFF800000> : vector<1x8xf32>
    %30 = vector.multi_reduction <maximumf>, %29, %cst_18 [2] : vector<1x8x8xf32> to vector<1x8xf32>
    %31 = vector.shape_cast %30 : vector<1x8xf32> to vector<1x8x1xf32>
    %32 = vector.broadcast %31 : vector<1x8x1xf32> to vector<1x8x8xf32>
    %33 = arith.subf %29, %32 : vector<1x8x8xf32>
    %34 = math.exp %33 : vector<1x8x8xf32>
    %cst_19 = arith.constant dense<0.000000e+00> : vector<1x8xf32>
    %35 = vector.multi_reduction <add>, %34, %cst_19 [2] : vector<1x8x8xf32> to vector<1x8xf32>
    %36 = vector.shape_cast %35 : vector<1x8xf32> to vector<1x8x1xf32>
    %37 = tpu.reciprocal %36 {approx = true} : vector<1x8x1xf32> -> vector<1x8x1xf32>
    %38 = vector.broadcast %37 : vector<1x8x1xf32> to vector<1x8x8xf32>
    %39 = arith.mulf %34, %38 : vector<1x8x8xf32>
    %40 = arith.truncf %39 : vector<1x8x8xf32> to vector<1x8x8xbf16>
    "tpu.trace_start"() <{level = 10 : i32, message = "blm,bmd->bld"}> : () -> ()
    %cst_20 = arith.constant dense<0.000000e+00> : vector<1x8x16xf32>
    %41 = tpu.matmul %40, %28, %cst_20 {dimension_numbers = #tpu.dot_dimension_numbers<[2], [1], [1], [2], [0, 0, 0, 1, 1, 2], [0], [0]>} : vector<1x8x8xbf16>, vector<1x8x16xbf16>, vector<1x8x16xf32> -> vector<1x8x16xf32>
    "tpu.trace_stop"() : () -> ()
    %42 = vector.shape_cast %41 : vector<1x8x16xf32> to vector<8x16xf32>
    %43 = arith.truncf %42 : vector<8x16xf32> to vector<8x16xbf16>
    %c0_21 = arith.constant 0 : index
    %c0_22 = arith.constant 0 : index
    %44 = vector.load %arg19[%c0_21, %c0_22] : memref<8x64xbf16, #tpu.memory_space<vmem>>, vector<8x16xbf16>
    tpu.vector_store %arg19[%c0_21, %c0_22], %43 {strides = array<i32>} : memref<8x64xbf16, #tpu.memory_space<vmem>>, vector<8x16xbf16>,
    %45 = vector.extract_strided_slice %10 {offsets = [0, 16], sizes = [8, 16], strides = [1, 1]} : vector<8x64xbf16> to vector<8x16xbf16>
    %46 = vector.shape_cast %45 : vector<8x16xbf16> to vector<1x8x16xbf16>
    %47 = vector.extract_strided_slice %16 {offsets = [0, 16], sizes = [8, 16], strides = [1, 1]} : vector<8x64xbf16> to vector<8x16xbf16>
    %48 = vector.shape_cast %47 : vector<8x16xbf16> to vector<1x8x16xbf16>
    %49 = vector.extract_strided_slice %22 {offsets = [0, 16], sizes = [8, 16], strides = [1, 1]} : vector<8x64xbf16> to vector<8x16xbf16>
    %50 = vector.shape_cast %49 : vector<8x16xbf16> to vector<1x8x16xbf16>
    "tpu.trace_start"() <{level = 10 : i32, message = "bld,bmd->blm"}> : () -> ()
    %cst_23 = arith.constant dense<0.000000e+00> : vector<1x8x8xf32>
    %51 = tpu.matmul %46, %48, %cst_23 {dimension_numbers = #tpu.dot_dimension_numbers<[2], [2], [1], [1], [0, 0, 0, 1, 1, 1], [0], [0]>} : vector<1x8x16xbf16>, vector<1x8x16xbf16>, vector<1x8x8xf32> -> vector<1x8x8xf32>
    "tpu.trace_stop"() : () -> ()
    %cst_24 = arith.constant dense<0xFF800000> : vector<1x8xf32>
    %52 = vector.multi_reduction <maximumf>, %51, %cst_24 [2] : vector<1x8x8xf32> to vector<1x8xf32>
    %53 = vector.shape_cast %52 : vector<1x8xf32> to vector<1x8x1xf32>
    %54 = vector.broadcast %53 : vector<1x8x1xf32> to vector<1x8x8xf32>
    %55 = arith.subf %51, %54 : vector<1x8x8xf32>
    %56 = math.exp %55 : vector<1x8x8xf32>
    %cst_25 = arith.constant dense<0.000000e+00> : vector<1x8xf32>
    %57 = vector.multi_reduction <add>, %56, %cst_25 [2] : vector<1x8x8xf32> to vector<1x8xf32>
    %58 = vector.shape_cast %57 : vector<1x8xf32> to vector<1x8x1xf32>
    %59 = tpu.reciprocal %58 {approx = true} : vector<1x8x1xf32> -> vector<1x8x1xf32>
    %60 = vector.broadcast %59 : vector<1x8x1xf32> to vector<1x8x8xf32>
    %61 = arith.mulf %56, %60 : vector<1x8x8xf32>
    %62 = arith.truncf %61 : vector<1x8x8xf32> to vector<1x8x8xbf16>
    "tpu.trace_start"() <{level = 10 : i32, message = "blm,bmd->bld"}> : () -> ()
    %cst_26 = arith.constant dense<0.000000e+00> : vector<1x8x16xf32>
    %63 = tpu.matmul %62, %50, %cst_26 {dimension_numbers = #tpu.dot_dimension_numbers<[2], [1], [1], [2], [0, 0, 0, 1, 1, 2], [0], [0]>} : vector<1x8x8xbf16>, vector<1x8x16xbf16>, vector<1x8x16xf32> -> vector<1x8x16xf32>
    "tpu.trace_stop"() : () -> ()
    %64 = vector.shape_cast %63 : vector<1x8x16xf32> to vector<8x16xf32>
    %65 = arith.truncf %64 : vector<8x16xf32> to vector<8x16xbf16>
    %c0_27 = arith.constant 0 : index
    %c16 = arith.constant 16 : index
    %66 = vector.load %arg19[%c0_27, %c16] : memref<8x64xbf16, #tpu.memory_space<vmem>>, vector<8x16xbf16>
    tpu.vector_store %arg19[%c0_27, %c16], %65 {strides = array<i32>} : memref<8x64xbf16, #tpu.memory_space<vmem>>, vector<8x16xbf16>,
    %67 = vector.extract_strided_slice %10 {offsets = [0, 32], sizes = [8, 16], strides = [1, 1]} : vector<8x64xbf16> to vector<8x16xbf16>
    %68 = vector.shape_cast %67 : vector<8x16xbf16> to vector<1x8x16xbf16>
    %69 = vector.extract_strided_slice %16 {offsets = [0, 32], sizes = [8, 16], strides = [1, 1]} : vector<8x64xbf16> to vector<8x16xbf16>
    %70 = vector.shape_cast %69 : vector<8x16xbf16> to vector<1x8x16xbf16>
    %71 = vector.extract_strided_slice %22 {offsets = [0, 32], sizes = [8, 16], strides = [1, 1]} : vector<8x64xbf16> to vector<8x16xbf16>
    %72 = vector.shape_cast %71 : vector<8x16xbf16> to vector<1x8x16xbf16>
    "tpu.trace_start"() <{level = 10 : i32, message = "bld,bmd->blm"}> : () -> ()
    %cst_28 = arith.constant dense<0.000000e+00> : vector<1x8x8xf32>
    %73 = tpu.matmul %68, %70, %cst_28 {dimension_numbers = #tpu.dot_dimension_numbers<[2], [2], [1], [1], [0, 0, 0, 1, 1, 1], [0], [0]>} : vector<1x8x16xbf16>, vector<1x8x16xbf16>, vector<1x8x8xf32> -> vector<1x8x8xf32>
    "tpu.trace_stop"() : () -> ()
    %cst_29 = arith.constant dense<0xFF800000> : vector<1x8xf32>
    %74 = vector.multi_reduction <maximumf>, %73, %cst_29 [2] : vector<1x8x8xf32> to vector<1x8xf32>
    %75 = vector.shape_cast %74 : vector<1x8xf32> to vector<1x8x1xf32>
    %76 = vector.broadcast %75 : vector<1x8x1xf32> to vector<1x8x8xf32>
    %77 = arith.subf %73, %76 : vector<1x8x8xf32>
    %78 = math.exp %77 : vector<1x8x8xf32>
    %cst_30 = arith.constant dense<0.000000e+00> : vector<1x8xf32>
    %79 = vector.multi_reduction <add>, %78, %cst_30 [2] : vector<1x8x8xf32> to vector<1x8xf32>
    %80 = vector.shape_cast %79 : vector<1x8xf32> to vector<1x8x1xf32>
    %81 = tpu.reciprocal %80 {approx = true} : vector<1x8x1xf32> -> vector<1x8x1xf32>
    %82 = vector.broadcast %81 : vector<1x8x1xf32> to vector<1x8x8xf32>
    %83 = arith.mulf %78, %82 : vector<1x8x8xf32>
    %84 = arith.truncf %83 : vector<1x8x8xf32> to vector<1x8x8xbf16>
    "tpu.trace_start"() <{level = 10 : i32, message = "blm,bmd->bld"}> : () -> ()
    %cst_31 = arith.constant dense<0.000000e+00> : vector<1x8x16xf32>
    %85 = tpu.matmul %84, %72, %cst_31 {dimension_numbers = #tpu.dot_dimension_numbers<[2], [1], [1], [2], [0, 0, 0, 1, 1, 2], [0], [0]>} : vector<1x8x8xbf16>, vector<1x8x16xbf16>, vector<1x8x16xf32> -> vector<1x8x16xf32>
    "tpu.trace_stop"() : () -> ()
    %86 = vector.shape_cast %85 : vector<1x8x16xf32> to vector<8x16xf32>
    %87 = arith.truncf %86 : vector<8x16xf32> to vector<8x16xbf16>
    %c0_32 = arith.constant 0 : index
    %c32 = arith.constant 32 : index
    %88 = vector.load %arg19[%c0_32, %c32] : memref<8x64xbf16, #tpu.memory_space<vmem>>, vector<8x16xbf16>
    tpu.vector_store %arg19[%c0_32, %c32], %87 {strides = array<i32>} : memref<8x64xbf16, #tpu.memory_space<vmem>>, vector<8x16xbf16>,
    %89 = vector.extract_strided_slice %10 {offsets = [0, 48], sizes = [8, 16], strides = [1, 1]} : vector<8x64xbf16> to vector<8x16xbf16>
    %90 = vector.shape_cast %89 : vector<8x16xbf16> to vector<1x8x16xbf16>
    %91 = vector.extract_strided_slice %16 {offsets = [0, 48], sizes = [8, 16], strides = [1, 1]} : vector<8x64xbf16> to vector<8x16xbf16>
    %92 = vector.shape_cast %91 : vector<8x16xbf16> to vector<1x8x16xbf16>
    %93 = vector.extract_strided_slice %22 {offsets = [0, 48], sizes = [8, 16], strides = [1, 1]} : vector<8x64xbf16> to vector<8x16xbf16>
    %94 = vector.shape_cast %93 : vector<8x16xbf16> to vector<1x8x16xbf16>
    "tpu.trace_start"() <{level = 10 : i32, message = "bld,bmd->blm"}> : () -> ()
    %cst_33 = arith.constant dense<0.000000e+00> : vector<1x8x8xf32>
    %95 = tpu.matmul %90, %92, %cst_33 {dimension_numbers = #tpu.dot_dimension_numbers<[2], [2], [1], [1], [0, 0, 0, 1, 1, 1], [0], [0]>} : vector<1x8x16xbf16>, vector<1x8x16xbf16>, vector<1x8x8xf32> -> vector<1x8x8xf32>
    "tpu.trace_stop"() : () -> ()
    %cst_34 = arith.constant dense<0xFF800000> : vector<1x8xf32>
    %96 = vector.multi_reduction <maximumf>, %95, %cst_34 [2] : vector<1x8x8xf32> to vector<1x8xf32>
    %97 = vector.shape_cast %96 : vector<1x8xf32> to vector<1x8x1xf32>
    %98 = vector.broadcast %97 : vector<1x8x1xf32> to vector<1x8x8xf32>
    %99 = arith.subf %95, %98 : vector<1x8x8xf32>
    %100 = math.exp %99 : vector<1x8x8xf32>
    %cst_35 = arith.constant dense<0.000000e+00> : vector<1x8xf32>
    %101 = vector.multi_reduction <add>, %100, %cst_35 [2] : vector<1x8x8xf32> to vector<1x8xf32>
    %102 = vector.shape_cast %101 : vector<1x8xf32> to vector<1x8x1xf32>
    %103 = tpu.reciprocal %102 {approx = true} : vector<1x8x1xf32> -> vector<1x8x1xf32>
    %104 = vector.broadcast %103 : vector<1x8x1xf32> to vector<1x8x8xf32>
    %105 = arith.mulf %100, %104 : vector<1x8x8xf32>
    %106 = arith.truncf %105 : vector<1x8x8xf32> to vector<1x8x8xbf16>
    "tpu.trace_start"() <{level = 10 : i32, message = "blm,bmd->bld"}> : () -> ()
    %cst_36 = arith.constant dense<0.000000e+00> : vector<1x8x16xf32>
    %107 = tpu.matmul %106, %94, %cst_36 {dimension_numbers = #tpu.dot_dimension_numbers<[2], [1], [1], [2], [0, 0, 0, 1, 1, 2], [0], [0]>} : vector<1x8x8xbf16>, vector<1x8x16xbf16>, vector<1x8x16xf32> -> vector<1x8x16xf32>
    "tpu.trace_stop"() : () -> ()
    %108 = vector.shape_cast %107 : vector<1x8x16xf32> to vector<8x16xf32>
    %109 = arith.truncf %108 : vector<8x16xf32> to vector<8x16xbf16>
    %c0_37 = arith.constant 0 : index
    %c48 = arith.constant 48 : index
    %110 = vector.load %arg19[%c0_37, %c48] : memref<8x64xbf16, #tpu.memory_space<vmem>>, vector<8x16xbf16>
    tpu.vector_store %arg19[%c0_37, %c48], %109 {strides = array<i32>} : memref<8x64xbf16, #tpu.memory_space<vmem>>, vector<8x16xbf16>,
    %c0_38 = arith.constant 0 : index
    %c0_39 = arith.constant 0 : index
    %111 = vector.load %arg19[%c0_38, %c0_39] : memref<8x64xbf16, #tpu.memory_space<vmem>>, vector<8x64xbf16>
    %c0_40 = arith.constant 0 : index
    %c0_41 = arith.constant 0 : index
    %112 = vector.load %arg8[%c0_40, %c0_41] : memref<64x64xbf16, #tpu.memory_space<vmem>>, vector<64x64xbf16>
    %cst_42 = arith.constant dense<0.000000e+00> : vector<8x64xf32>
    %113 = tpu.matmul %111, %112, %cst_42 {dimension_numbers = #tpu.dot_dimension_numbers<[1], [0], [0], [1], [0, 0, 1, 1], [], []>} : vector<8x64xbf16>, vector<64x64xbf16>, vector<8x64xf32> -> vector<8x64xf32>
    %c0_43 = arith.constant 0 : index
    %c0_44 = arith.constant 0 : index
    %114 = vector.load %arg9[%c0_43, %c0_44] : memref<1x64xf32, #tpu.memory_space<vmem>>, vector<1x64xf32>
    %115 = vector.broadcast %114 : vector<1x64xf32> to vector<8x64xf32>
    %116 = arith.addf %113, %115 : vector<8x64xf32>
    %c0_45 = arith.constant 0 : index
    %c0_46 = arith.constant 0 : index
    %117 = vector.load %arg10[%c0_45, %c0_46] : memref<1x64xf32, #tpu.memory_space<vmem>>, vector<1x64xf32>
    %c0_47 = arith.constant 0 : index
    %c0_48 = arith.constant 0 : index
    %118 = vector.load %arg11[%c0_47, %c0_48] : memref<1x64xf32, #tpu.memory_space<vmem>>, vector<1x64xf32>
    %cst_49 = arith.constant dense<0.000000e+00> : vector<8xf32>
    %119 = vector.multi_reduction <add>, %116, %cst_49 [1] : vector<8x64xf32> to vector<8xf32>
    %120 = vector.shape_cast %119 : vector<8xf32> to vector<8x1xf32>
    %cst_50 = arith.constant 6.400000e+01 : f32
    %121 = vector.broadcast %cst_50 : f32 to vector<8x1xf32>
    %122 = arith.divf %120, %121 : vector<8x1xf32>
    %123 = vector.broadcast %122 : vector<8x1xf32> to vector<8x64xf32>
    %124 = arith.subf %116, %123 : vector<8x64xf32>
    %125 = arith.mulf %124, %124 : vector<8x64xf32>
    %cst_51 = arith.constant dense<0.000000e+00> : vector<8xf32>
    %126 = vector.multi_reduction <add>, %125, %cst_51 [1] : vector<8x64xf32> to vector<8xf32>
    %127 = vector.shape_cast %126 : vector<8xf32> to vector<8x1xf32>
    %cst_52 = arith.constant 6.400000e+01 : f32
    %128 = vector.broadcast %cst_52 : f32 to vector<8x1xf32>
    %129 = arith.divf %127, %128 : vector<8x1xf32>
    %130 = vector.broadcast %122 : vector<8x1xf32> to vector<8x64xf32>
    %131 = arith.subf %116, %130 : vector<8x64xf32>
    %cst_53 = arith.constant 9.99999974E-6 : f32
    %132 = vector.broadcast %cst_53 : f32 to vector<8x1xf32>
    %133 = arith.addf %129, %132 : vector<8x1xf32>
    %134 = math.rsqrt %133 : vector<8x1xf32>
    %135 = vector.broadcast %134 : vector<8x1xf32> to vector<8x64xf32>
    %136 = arith.mulf %131, %135 : vector<8x64xf32>
    %137 = vector.broadcast %117 : vector<1x64xf32> to vector<8x64xf32>
    %138 = arith.mulf %136, %137 : vector<8x64xf32>
    %139 = vector.broadcast %118 : vector<1x64xf32> to vector<8x64xf32>
    %140 = arith.addf %138, %139 : vector<8x64xf32>
    %141 = arith.addf %140, %1 : vector<8x64xf32>
    %142 = arith.truncf %141 : vector<8x64xf32> to vector<8x64xbf16>
    %c0_54 = arith.constant 0 : index
    %c0_55 = arith.constant 0 : index
    %143 = vector.load %arg12[%c0_54, %c0_55] : memref<64x128xbf16, #tpu.memory_space<vmem>>, vector<64x128xbf16>
    %cst_56 = arith.constant dense<0.000000e+00> : vector<8x128xf32>
    %144 = tpu.matmul %142, %143, %cst_56 {dimension_numbers = #tpu.dot_dimension_numbers<[1], [0], [0], [1], [0, 0, 1, 1], [], []>} : vector<8x64xbf16>, vector<64x128xbf16>, vector<8x128xf32> -> vector<8x128xf32>
    %c0_57 = arith.constant 0 : index
    %c0_58 = arith.constant 0 : index
    %145 = vector.load %arg13[%c0_57, %c0_58] : memref<1x128xf32, #tpu.memory_space<vmem>>, vector<1x128xf32>
    %146 = vector.broadcast %145 : vector<1x128xf32> to vector<8x128xf32>
    %147 = arith.addf %144, %146 : vector<8x128xf32>
    %cst_59 = arith.constant 5.000000e-01 : f32
    %148 = vector.broadcast %cst_59 : f32 to vector<8x128xf32>
    %149 = arith.mulf %148, %147 : vector<8x128xf32>
    %cst_60 = arith.constant 0.707106769 : f32
    %150 = vector.broadcast %cst_60 : f32 to vector<8x128xf32>
    %151 = arith.mulf %147, %150 : vector<8x128xf32>
    %152 = math.erf %151 : vector<8x128xf32>
    %cst_61 = arith.constant 1.000000e+00 : f32
    %153 = vector.broadcast %cst_61 : f32 to vector<8x128xf32>
    %154 = arith.addf %153, %152 : vector<8x128xf32>
    %155 = arith.mulf %149, %154 : vector<8x128xf32>
    %156 = arith.truncf %155 : vector<8x128xf32> to vector<8x128xbf16>
    %c0_62 = arith.constant 0 : index
    %c0_63 = arith.constant 0 : index
    %157 = vector.load %arg14[%c0_62, %c0_63] : memref<128x64xbf16, #tpu.memory_space<vmem>>, vector<128x64xbf16>
    %cst_64 = arith.constant dense<0.000000e+00> : vector<8x64xf32>
    %158 = tpu.matmul %156, %157, %cst_64 {dimension_numbers = #tpu.dot_dimension_numbers<[1], [0], [0], [1], [0, 0, 1, 1], [], []>} : vector<8x128xbf16>, vector<128x64xbf16>, vector<8x64xf32> -> vector<8x64xf32>
    %c0_65 = arith.constant 0 : index
    %c0_66 = arith.constant 0 : index
    %159 = vector.load %arg15[%c0_65, %c0_66] : memref<1x64xf32, #tpu.memory_space<vmem>>, vector<1x64xf32>
    %160 = vector.broadcast %159 : vector<1x64xf32> to vector<8x64xf32>
    %161 = arith.addf %158, %160 : vector<8x64xf32>
    %c0_67 = arith.constant 0 : index
    %c0_68 = arith.constant 0 : index
    %162 = vector.load %arg16[%c0_67, %c0_68] : memref<1x64xf32, #tpu.memory_space<vmem>>, vector<1x64xf32>
    %c0_69 = arith.constant 0 : index
    %c0_70 = arith.constant 0 : index
    %163 = vector.load %arg17[%c0_69, %c0_70] : memref<1x64xf32, #tpu.memory_space<vmem>>, vector<1x64xf32>
    %cst_71 = arith.constant dense<0.000000e+00> : vector<8xf32>
    %164 = vector.multi_reduction <add>, %161, %cst_71 [1] : vector<8x64xf32> to vector<8xf32>
    %165 = vector.shape_cast %164 : vector<8xf32> to vector<8x1xf32>
    %cst_72 = arith.constant 6.400000e+01 : f32
    %166 = vector.broadcast %cst_72 : f32 to vector<8x1xf32>
    %167 = arith.divf %165, %166 : vector<8x1xf32>
    %168 = vector.broadcast %167 : vector<8x1xf32> to vector<8x64xf32>
    %169 = arith.subf %161, %168 : vector<8x64xf32>
    %170 = arith.mulf %169, %169 : vector<8x64xf32>
    %cst_73 = arith.constant dense<0.000000e+00> : vector<8xf32>
    %171 = vector.multi_reduction <add>, %170, %cst_73 [1] : vector<8x64xf32> to vector<8xf32>
    %172 = vector.shape_cast %171 : vector<8xf32> to vector<8x1xf32>
    %cst_74 = arith.constant 6.400000e+01 : f32
    %173 = vector.broadcast %cst_74 : f32 to vector<8x1xf32>
    %174 = arith.divf %172, %173 : vector<8x1xf32>
    %175 = vector.broadcast %167 : vector<8x1xf32> to vector<8x64xf32>
    %176 = arith.subf %161, %175 : vector<8x64xf32>
    %cst_75 = arith.constant 9.99999974E-6 : f32
    %177 = vector.broadcast %cst_75 : f32 to vector<8x1xf32>
    %178 = arith.addf %174, %177 : vector<8x1xf32>
    %179 = math.rsqrt %178 : vector<8x1xf32>
    %180 = vector.broadcast %179 : vector<8x1xf32> to vector<8x64xf32>
    %181 = arith.mulf %176, %180 : vector<8x64xf32>
    %182 = vector.broadcast %162 : vector<1x64xf32> to vector<8x64xf32>
    %183 = arith.mulf %181, %182 : vector<8x64xf32>
    %184 = vector.broadcast %163 : vector<1x64xf32> to vector<8x64xf32>
    %185 = arith.addf %183, %184 : vector<8x64xf32>
    %186 = arith.addf %185, %141 : vector<8x64xf32>
    %187 = vector.shape_cast %186 : vector<8x64xf32> to vector<1x8x64xf32>
    %c0_76 = arith.constant 0 : index
    %c0_77 = arith.constant 0 : index
    %c0_78 = arith.constant 0 : index
    %188 = vector.load %arg18[%c0_76, %c0_77, %c0_78] : memref<1x8x64xf32, #tpu.memory_space<vmem>>, vector<1x8x64xf32>
    tpu.vector_store %arg18[%c0_76, %c0_77, %c0_78], %187 {strides = array<i32>} : memref<1x8x64xf32, #tpu.memory_space<vmem>>, vector<1x8x64xf32>,
    return
  }
  func.func @transform_0(%arg0: i32) -> (i32, i32, i32) {
    %c0_i32 = arith.constant 0 : i32
    %c0_i32_0 = arith.constant 0 : i32
    %c0_i32_1 = arith.constant 0 : i32
    return %arg0, %c0_i32, %c0_i32_0 : i32, i32, i32
  }
  func.func @transform_1(%arg0: i32) -> (i32, i32) {
    %c0_i32 = arith.constant 0 : i32
    %c0_i32_0 = arith.constant 0 : i32
    %c0_i32_1 = arith.constant 0 : i32
    return %c0_i32, %c0_i32_0 : i32, i32
  }
  func.func @transform_2(%arg0: i32) -> (i32, i32) {
    %c0_i32 = arith.constant 0 : i32
    %c0_i32_0 = arith.constant 0 : i32
    %c0_i32_1 = arith.constant 0 : i32
    return %c0_i32, %c0_i32_0 : i32, i32
  }
  func.func @transform_3(%arg0: i32) -> (i32, i32) {
    %c0_i32 = arith.constant 0 : i32
    %c0_i32_0 = arith.constant 0 : i32
    %c0_i32_1 = arith.constant 0 : i32
    return %c0_i32, %c0_i32_0 : i32, i32
  }
  func.func @transform_4(%arg0: i32) -> (i32, i32) {
    %c0_i32 = arith.constant 0 : i32
    %c0_i32_0 = arith.constant 0 : i32
    %c0_i32_1 = arith.constant 0 : i32
    return %c0_i32, %c0_i32_0 : i32, i32
  }
  func.func @transform_5(%arg0: i32) -> (i32, i32) {
    %c0_i32 = arith.constant 0 : i32
    %c0_i32_0 = arith.constant 0 : i32
    %c0_i32_1 = arith.constant 0 : i32
    return %c0_i32, %c0_i32_0 : i32, i32
  }
  func.func @transform_6(%arg0: i32) -> (i32, i32) {
    %c0_i32 = arith.constant 0 : i32
    %c0_i32_0 = arith.constant 0 : i32
    %c0_i32_1 = arith.constant 0 : i32
    return %c0_i32, %c0_i32_0 : i32, i32
  }
  func.func @transform_7(%arg0: i32) -> (i32, i32) {
    %c0_i32 = arith.constant 0 : i32
    %c0_i32_0 = arith.constant 0 : i32
    %c0_i32_1 = arith.constant 0 : i32
    return %c0_i32, %c0_i32_0 : i32, i32
  }
  func.func @transform_8(%arg0: i32) -> (i32, i32) {
    %c0_i32 = arith.constant 0 : i32
    %c0_i32_0 = arith.constant 0 : i32
    %c0_i32_1 = arith.constant 0 : i32
    return %c0_i32, %c0_i32_0 : i32, i32
  }
  func.func @transform_9(%arg0: i32) -> (i32, i32) {
    %c0_i32 = arith.constant 0 : i32
    %c0_i32_0 = arith.constant 0 : i32
    %c0_i32_1 = arith.constant 0 : i32
    return %c0_i32, %c0_i32_0 : i32, i32
  }
  func.func @transform_10(%arg0: i32) -> (i32, i32) {
    %c0_i32 = arith.constant 0 : i32
    %c0_i32_0 = arith.constant 0 : i32
    %c0_i32_1 = arith.constant 0 : i32
    return %c0_i32, %c0_i32_0 : i32, i32
  }
  func.func @transform_11(%arg0: i32) -> (i32, i32) {
    %c0_i32 = arith.constant 0 : i32
    %c0_i32_0 = arith.constant 0 : i32
    %c0_i32_1 = arith.constant 0 : i32
    return %c0_i32, %c0_i32_0 : i32, i32
  }
  func.func @transform_12(%arg0: i32) -> (i32, i32) {
    %c0_i32 = arith.constant 0 : i32
    %c0_i32_0 = arith.constant 0 : i32
    %c0_i32_1 = arith.constant 0 : i32
    return %c0_i32, %c0_i32_0 : i32, i32
  }
  func.func @transform_13(%arg0: i32) -> (i32, i32) {
    %c0_i32 = arith.constant 0 : i32
    %c0_i32_0 = arith.constant 0 : i32
    %c0_i32_1 = arith.constant 0 : i32
    return %c0_i32, %c0_i32_0 : i32, i32
  }
  func.func @transform_14(%arg0: i32) -> (i32, i32) {
    %c0_i32 = arith.constant 0 : i32
    %c0_i32_0 = arith.constant 0 : i32
    %c0_i32_1 = arith.constant 0 : i32
    return %c0_i32, %c0_i32_0 : i32, i32
  }
  func.func @transform_15(%arg0: i32) -> (i32, i32) {
    %c0_i32 = arith.constant 0 : i32
    %c0_i32_0 = arith.constant 0 : i32
    %c0_i32_1 = arith.constant 0 : i32
    return %c0_i32, %c0_i32_0 : i32, i32
  }
  func.func @transform_16(%arg0: i32) -> (i32, i32) {
    %c0_i32 = arith.constant 0 : i32
    %c0_i32_0 = arith.constant 0 : i32
    %c0_i32_1 = arith.constant 0 : i32
    return %c0_i32, %c0_i32_0 : i32, i32
  }
  func.func @transform_17(%arg0: i32) -> (i32, i32, i32) {
    %c0_i32 = arith.constant 0 : i32
    %c0_i32_0 = arith.constant 0 : i32
    %c0_i32_1 = arith.constant 0 : i32
    return %arg0, %c0_i32, %c0_i32_0 : i32, i32, i32
  }
}

module attributes {stable_mosaic.version = 11 : i64} {
  func.func @transformer_layer_kernel(%arg0: i32, %arg1: memref<1x8x64xf32, #tpu.memory_space<vmem>>, %arg2: memref<64x64xbf16, #tpu.memory_space<vmem>>, %arg3: memref<1x64xf32, #tpu.memory_space<vmem>>, %arg4: memref<64x64xbf16, #tpu.memory_space<vmem>>, %arg5: memref<1x64xf32, #tpu.memory_space<vmem>>, %arg6: memref<64x64xbf16, #tpu.memory_space<vmem>>, %arg7: memref<1x64xf32, #tpu.memory_space<vmem>>, %arg8: memref<64x64xbf16, #tpu.memory_space<vmem>>, %arg9: memref<1x64xf32, #tpu.memory_space<vmem>>, %arg10: memref<1x64xf32, #tpu.memory_space<vmem>>, %arg11: memref<1x64xf32, #tpu.memory_space<vmem>>, %arg12: memref<64x128xbf16, #tpu.memory_space<vmem>>, %arg13: memref<1x128xf32, #tpu.memory_space<vmem>>, %arg14: memref<128x64xbf16, #tpu.memory_space<vmem>>, %arg15: memref<1x64xf32, #tpu.memory_space<vmem>>, %arg16: memref<1x64xf32, #tpu.memory_space<vmem>>, %arg17: memref<1x64xf32, #tpu.memory_space<vmem>>, %arg18: memref<1x8x64xf32, #tpu.memory_space<vmem>>, %arg19: memref<8x64xbf16, #tpu.memory_space<vmem>>) attributes {dimension_semantics = [#tpu.dimension_semantics<parallel>], iteration_bounds = array<i64: 2>, scalar_prefetch = 0 : i64, scratch_operands = 1 : i64, tpu.core_type = #tpu.core_type<tc>, window_params = [{transform_indices = @transform_0, window_bounds = array<i64: 1, 8, 64>}, {pipeline_mode = #tpu.pipeline_mode<synchronous>, transform_indices = @transform_1, window_bounds = array<i64: 64, 64>}, {pipeline_mode = #tpu.pipeline_mode<synchronous>, transform_indices = @transform_2, window_bounds = array<i64: 1, 64>}, {pipeline_mode = #tpu.pipeline_mode<synchronous>, transform_indices = @transform_3, window_bounds = array<i64: 64, 64>}, {pipeline_mode = #tpu.pipeline_mode<synchronous>, transform_indices = @transform_4, window_bounds = array<i64: 1, 64>}, {pipeline_mode = #tpu.pipeline_mode<synchronous>, transform_indices = @transform_5, window_bounds = array<i64: 64, 64>}, {pipeline_mode = #tpu.pipeline_mode<synchronous>, transform_indices = @transform_6, window_bounds = array<i64: 1, 64>}, {pipeline_mode = #tpu.pipeline_mode<synchronous>, transform_indices = @transform_7, window_bounds = array<i64: 64, 64>}, {pipeline_mode = #tpu.pipeline_mode<synchronous>, transform_indices = @transform_8, window_bounds = array<i64: 1, 64>}, {pipeline_mode = #tpu.pipeline_mode<synchronous>, transform_indices = @transform_9, window_bounds = array<i64: 1, 64>}, {pipeline_mode = #tpu.pipeline_mode<synchronous>, transform_indices = @transform_10, window_bounds = array<i64: 1, 64>}, {pipeline_mode = #tpu.pipeline_mode<synchronous>, transform_indices = @transform_11, window_bounds = array<i64: 64, 128>}, {pipeline_mode = #tpu.pipeline_mode<synchronous>, transform_indices = @transform_12, window_bounds = array<i64: 1, 128>}, {pipeline_mode = #tpu.pipeline_mode<synchronous>, transform_indices = @transform_13, window_bounds = array<i64: 128, 64>}, {pipeline_mode = #tpu.pipeline_mode<synchronous>, transform_indices = @transform_14, window_bounds = array<i64: 1, 64>}, {pipeline_mode = #tpu.pipeline_mode<synchronous>, transform_indices = @transform_15, window_bounds = array<i64: 1, 64>}, {pipeline_mode = #tpu.pipeline_mode<synchronous>, transform_indices = @transform_16, window_bounds = array<i64: 1, 64>}, {transform_indices = @transform_17, window_bounds = array<i64: 1, 8, 64>}]} {
    %c0 = arith.constant 0 : index
    %c0_0 = arith.constant 0 : index
    %c0_1 = arith.constant 0 : index
    %0 = vector.load %arg1[%c0, %c0_0, %c0_1] : memref<1x8x64xf32, #tpu.memory_space<vmem>>, vector<1x8x64xf32>
    %1 = vector.shape_cast %0 : vector<1x8x64xf32> to vector<8x64xf32>
    %2 = arith.truncf %1 : vector<8x64xf32> to vector<8x64xbf16>
    %c0_2 = arith.constant 0 : index
    %c0_3 = arith.constant 0 : index
    %3 = vector.load %arg2[%c0_2, %c0_3] : memref<64x64xbf16, #tpu.memory_space<vmem>>, vector<64x64xbf16>
    %cst = arith.constant dense<0.000000e+00> : vector<8x64xf32>
    %4 = tpu.matmul %2, %3, %cst {dimension_numbers = #tpu.dot_dimension_numbers<[1], [0], [0], [1], [0, 0, 1, 1], [], []>} : vector<8x64xbf16>, vector<64x64xbf16>, vector<8x64xf32> -> vector<8x64xf32>
    %c0_4 = arith.constant 0 : index
    %c0_5 = arith.constant 0 : index
    %5 = vector.load %arg3[%c0_4, %c0_5] : memref<1x64xf32, #tpu.memory_space<vmem>>, vector<1x64xf32>
    %6 = vector.broadcast %5 : vector<1x64xf32> to vector<8x64xf32>
    %7 = arith.addf %4, %6 : vector<8x64xf32>
    %cst_6 = arith.constant 2.500000e-01 : f32
    %8 = vector.broadcast %cst_6 : f32 to vector<8x64xf32>
    %9 = arith.mulf %7, %8 : vector<8x64xf32>
    %10 = arith.truncf %9 : vector<8x64xf32> to vector<8x64xbf16>
    %c0_7 = arith.constant 0 : index
    %c0_8 = arith.constant 0 : index
    %11 = vector.load %arg4[%c0_7, %c0_8] : memref<64x64xbf16, #tpu.memory_space<vmem>>, vector<64x64xbf16>
    %cst_9 = arith.constant dense<0.000000e+00> : vector<8x64xf32>
    %12 = tpu.matmul %2, %11, %cst_9 {dimension_numbers = #tpu.dot_dimension_numbers<[1], [0], [0], [1], [0, 0, 1, 1], [], []>} : vector<8x64xbf16>, vector<64x64xbf16>, vector<8x64xf32> -> vector<8x64xf32>
    %c0_10 = arith.constant 0 : index
    %c0_11 = arith.constant 0 : index
    %13 = vector.load %arg5[%c0_10, %c0_11] : memref<1x64xf32, #tpu.memory_space<vmem>>, vector<1x64xf32>
    %14 = vector.broadcast %13 : vector<1x64xf32> to vector<8x64xf32>
    %15 = arith.addf %12, %14 : vector<8x64xf32>
    %16 = arith.truncf %15 : vector<8x64xf32> to vector<8x64xbf16>
    %c0_12 = arith.constant 0 : index
    %c0_13 = arith.constant 0 : index
    %17 = vector.load %arg6[%c0_12, %c0_13] : memref<64x64xbf16, #tpu.memory_space<vmem>>, vector<64x64xbf16>
    %cst_14 = arith.constant dense<0.000000e+00> : vector<8x64xf32>
    %18 = tpu.matmul %2, %17, %cst_14 {dimension_numbers = #tpu.dot_dimension_numbers<[1], [0], [0], [1], [0, 0, 1, 1], [], []>} : vector<8x64xbf16>, vector<64x64xbf16>, vector<8x64xf32> -> vector<8x64xf32>
    %c0_15 = arith.constant 0 : index
    %c0_16 = arith.constant 0 : index
    %19 = vector.load %arg7[%c0_15, %c0_16] : memref<1x64xf32, #tpu.memory_space<vmem>>, vector<1x64xf32>
    %20 = vector.broadcast %19 : vector<1x64xf32> to vector<8x64xf32>
    %21 = arith.addf %18, %20 : vector<8x64xf32>
    %22 = arith.truncf %21 : vector<8x64xf32> to vector<8x64xbf16>
    %23 = vector.extract_strided_slice %10 {offsets = [0, 0], sizes = [8, 16], strides = [1, 1]} : vector<8x64xbf16> to vector<8x16xbf16>
    %24 = vector.shape_cast %23 : vector<8x16xbf16> to vector<1x8x16xbf16>
    %25 = vector.extract_strided_slice %16 {offsets = [0, 0], sizes = [8, 16], strides = [1, 1]} : vector<8x64xbf16> to vector<8x16xbf16>
    %26 = vector.shape_cast %25 : vector<8x16xbf16> to vector<1x8x16xbf16>
    %27 = vector.extract_strided_slice %22 {offsets = [0, 0], sizes = [8, 16], strides = [1, 1]} : vector<8x64xbf16> to vector<8x16xbf16>
    %28 = vector.shape_cast %27 : vector<8x16xbf16> to vector<1x8x16xbf16>
    "tpu.trace_start"() <{level = 10 : i32, message = "bld,bmd->blm"}> : () -> ()
    %cst_17 = arith.constant dense<0.000000e+00> : vector<1x8x8xf32>
    %29 = tpu.matmul %24, %26, %cst_17 {dimension_numbers = #tpu.dot_dimension_numbers<[2], [2], [1], [1], [0, 0, 0, 1, 1, 1], [0], [0]>} : vector<1x8x16xbf16>, vector<1x8x16xbf16>, vector<1x8x8xf32> -> vector<1x8x8xf32>
    "tpu.trace_stop"() : () -> ()
    %cst_18 = arith.constant dense<0xFF800000> : vector<1x8xf32>
    %30 = vector.multi_reduction <maximumf>, %29, %cst_18 [2] : vector<1x8x8xf32> to vector<1x8xf32>
    %31 = vector.shape_cast %30 : vector<1x8xf32> to vector<1x8x1xf32>
    %32 = vector.broadcast %31 : vector<1x8x1xf32> to vector<1x8x8xf32>
    %33 = arith.subf %29, %32 : vector<1x8x8xf32>
    %34 = math.exp %33 : vector<1x8x8xf32>
    %cst_19 = arith.constant dense<0.000000e+00> : vector<1x8xf32>
    %35 = vector.multi_reduction <add>, %34, %cst_19 [2] : vector<1x8x8xf32> to vector<1x8xf32>
    %36 = vector.shape_cast %35 : vector<1x8xf32> to vector<1x8x1xf32>
    %37 = tpu.reciprocal %36 {approx = true} : vector<1x8x1xf32> -> vector<1x8x1xf32>
    %38 = vector.broadcast %37 : vector<1x8x1xf32> to vector<1x8x8xf32>
    %39 = arith.mulf %34, %38 : vector<1x8x8xf32>
    %40 = arith.truncf %39 : vector<1x8x8xf32> to vector<1x8x8xbf16>
    "tpu.trace_start"() <{level = 10 : i32, message = "blm,bmd->bld"}> : () -> ()
    %cst_20 = arith.constant dense<0.000000e+00> : vector<1x8x16xf32>
    %41 = tpu.matmul %40, %28, %cst_20 {dimension_numbers = #tpu.dot_dimension_numbers<[2], [1], [1], [2], [0, 0, 0, 1, 1, 2], [0], [0]>} : vector<1x8x8xbf16>, vector<1x8x16xbf16>, vector<1x8x16xf32> -> vector<1x8x16xf32>
    "tpu.trace_stop"() : () -> ()
    %42 = vector.shape_cast %41 : vector<1x8x16xf32> to vector<8x16xf32>
    %43 = arith.truncf %42 : vector<8x16xf32> to vector<8x16xbf16>
    %c0_21 = arith.constant 0 : index
    %c0_22 = arith.constant 0 : index
    %44 = vector.load %arg19[%c0_21, %c0_22] : memref<8x64xbf16, #tpu.memory_space<vmem>>, vector<8x16xbf16>
    tpu.vector_store %arg19[%c0_21, %c0_22], %43 {strides = array<i32>} : memref<8x64xbf16, #tpu.memory_space<vmem>>, vector<8x16xbf16>,
    %45 = vector.extract_strided_slice %10 {offsets = [0, 16], sizes = [8, 16], strides = [1, 1]} : vector<8x64xbf16> to vector<8x16xbf16>
    %46 = vector.shape_cast %45 : vector<8x16xbf16> to vector<1x8x16xbf16>
    %47 = vector.extract_strided_slice %16 {offsets = [0, 16], sizes = [8, 16], strides = [1, 1]} : vector<8x64xbf16> to vector<8x16xbf16>
    %48 = vector.shape_cast %47 : vector<8x16xbf16> to vector<1x8x16xbf16>
    %49 = vector.extract_strided_slice %22 {offsets = [0, 16], sizes = [8, 16], strides = [1, 1]} : vector<8x64xbf16> to vector<8x16xbf16>
    %50 = vector.shape_cast %49 : vector<8x16xbf16> to vector<1x8x16xbf16>
    "tpu.trace_start"() <{level = 10 : i32, message = "bld,bmd->blm"}> : () -> ()
    %cst_23 = arith.constant dense<0.000000e+00> : vector<1x8x8xf32>
    %51 = tpu.matmul %46, %48, %cst_23 {dimension_numbers = #tpu.dot_dimension_numbers<[2], [2], [1], [1], [0, 0, 0, 1, 1, 1], [0], [0]>} : vector<1x8x16xbf16>, vector<1x8x16xbf16>, vector<1x8x8xf32> -> vector<1x8x8xf32>
    "tpu.trace_stop"() : () -> ()
    %cst_24 = arith.constant dense<0xFF800000> : vector<1x8xf32>
    %52 = vector.multi_reduction <maximumf>, %51, %cst_24 [2] : vector<1x8x8xf32> to vector<1x8xf32>
    %53 = vector.shape_cast %52 : vector<1x8xf32> to vector<1x8x1xf32>
    %54 = vector.broadcast %53 : vector<1x8x1xf32> to vector<1x8x8xf32>
    %55 = arith.subf %51, %54 : vector<1x8x8xf32>
    %56 = math.exp %55 : vector<1x8x8xf32>
    %cst_25 = arith.constant dense<0.000000e+00> : vector<1x8xf32>
    %57 = vector.multi_reduction <add>, %56, %cst_25 [2] : vector<1x8x8xf32> to vector<1x8xf32>
    %58 = vector.shape_cast %57 : vector<1x8xf32> to vector<1x8x1xf32>
    %59 = tpu.reciprocal %58 {approx = true} : vector<1x8x1xf32> -> vector<1x8x1xf32>
    %60 = vector.broadcast %59 : vector<1x8x1xf32> to vector<1x8x8xf32>
    %61 = arith.mulf %56, %60 : vector<1x8x8xf32>
    %62 = arith.truncf %61 : vector<1x8x8xf32> to vector<1x8x8xbf16>
    "tpu.trace_start"() <{level = 10 : i32, message = "blm,bmd->bld"}> : () -> ()
    %cst_26 = arith.constant dense<0.000000e+00> : vector<1x8x16xf32>
    %63 = tpu.matmul %62, %50, %cst_26 {dimension_numbers = #tpu.dot_dimension_numbers<[2], [1], [1], [2], [0, 0, 0, 1, 1, 2], [0], [0]>} : vector<1x8x8xbf16>, vector<1x8x16xbf16>, vector<1x8x16xf32> -> vector<1x8x16xf32>
    "tpu.trace_stop"() : () -> ()
    %64 = vector.shape_cast %63 : vector<1x8x16xf32> to vector<8x16xf32>
    %65 = arith.truncf %64 : vector<8x16xf32> to vector<8x16xbf16>
    %c0_27 = arith.constant 0 : index
    %c16 = arith.constant 16 : index
    %66 = vector.load %arg19[%c0_27, %c16] : memref<8x64xbf16, #tpu.memory_space<vmem>>, vector<8x16xbf16>
    tpu.vector_store %arg19[%c0_27, %c16], %65 {strides = array<i32>} : memref<8x64xbf16, #tpu.memory_space<vmem>>, vector<8x16xbf16>,
    %67 = vector.extract_strided_slice %10 {offsets = [0, 32], sizes = [8, 16], strides = [1, 1]} : vector<8x64xbf16> to vector<8x16xbf16>
    %68 = vector.shape_cast %67 : vector<8x16xbf16> to vector<1x8x16xbf16>
    %69 = vector.extract_strided_slice %16 {offsets = [0, 32], sizes = [8, 16], strides = [1, 1]} : vector<8x64xbf16> to vector<8x16xbf16>
    %70 = vector.shape_cast %69 : vector<8x16xbf16> to vector<1x8x16xbf16>
    %71 = vector.extract_strided_slice %22 {offsets = [0, 32], sizes = [8, 16], strides = [1, 1]} : vector<8x64xbf16> to vector<8x16xbf16>
    %72 = vector.shape_cast %71 : vector<8x16xbf16> to vector<1x8x16xbf16>
    "tpu.trace_start"() <{level = 10 : i32, message = "bld,bmd->blm"}> : () -> ()
    %cst_28 = arith.constant dense<0.000000e+00> : vector<1x8x8xf32>
    %73 = tpu.matmul %68, %70, %cst_28 {dimension_numbers = #tpu.dot_dimension_numbers<[2], [2], [1], [1], [0, 0, 0, 1, 1, 1], [0], [0]>} : vector<1x8x16xbf16>, vector<1x8x16xbf16>, vector<1x8x8xf32> -> vector<1x8x8xf32>
    "tpu.trace_stop"() : () -> ()
    %cst_29 = arith.constant dense<0xFF800000> : vector<1x8xf32>
    %74 = vector.multi_reduction <maximumf>, %73, %cst_29 [2] : vector<1x8x8xf32> to vector<1x8xf32>
    %75 = vector.shape_cast %74 : vector<1x8xf32> to vector<1x8x1xf32>
    %76 = vector.broadcast %75 : vector<1x8x1xf32> to vector<1x8x8xf32>
    %77 = arith.subf %73, %76 : vector<1x8x8xf32>
    %78 = math.exp %77 : vector<1x8x8xf32>
    %cst_30 = arith.constant dense<0.000000e+00> : vector<1x8xf32>
    %79 = vector.multi_reduction <add>, %78, %cst_30 [2] : vector<1x8x8xf32> to vector<1x8xf32>
    %80 = vector.shape_cast %79 : vector<1x8xf32> to vector<1x8x1xf32>
    %81 = tpu.reciprocal %80 {approx = true} : vector<1x8x1xf32> -> vector<1x8x1xf32>
    %82 = vector.broadcast %81 : vector<1x8x1xf32> to vector<1x8x8xf32>
    %83 = arith.mulf %78, %82 : vector<1x8x8xf32>
    %84 = arith.truncf %83 : vector<1x8x8xf32> to vector<1x8x8xbf16>
    "tpu.trace_start"() <{level = 10 : i32, message = "blm,bmd->bld"}> : () -> ()
    %cst_31 = arith.constant dense<0.000000e+00> : vector<1x8x16xf32>
    %85 = tpu.matmul %84, %72, %cst_31 {dimension_numbers = #tpu.dot_dimension_numbers<[2], [1], [1], [2], [0, 0, 0, 1, 1, 2], [0], [0]>} : vector<1x8x8xbf16>, vector<1x8x16xbf16>, vector<1x8x16xf32> -> vector<1x8x16xf32>
    "tpu.trace_stop"() : () -> ()
    %86 = vector.shape_cast %85 : vector<1x8x16xf32> to vector<8x16xf32>
    %87 = arith.truncf %86 : vector<8x16xf32> to vector<8x16xbf16>
    %c0_32 = arith.constant 0 : index
    %c32 = arith.constant 32 : index
    %88 = vector.load %arg19[%c0_32, %c32] : memref<8x64xbf16, #tpu.memory_space<vmem>>, vector<8x16xbf16>
    tpu.vector_store %arg19[%c0_32, %c32], %87 {strides = array<i32>} : memref<8x64xbf16, #tpu.memory_space<vmem>>, vector<8x16xbf16>,
    %89 = vector.extract_strided_slice %10 {offsets = [0, 48], sizes = [8, 16], strides = [1, 1]} : vector<8x64xbf16> to vector<8x16xbf16>
    %90 = vector.shape_cast %89 : vector<8x16xbf16> to vector<1x8x16xbf16>
    %91 = vector.extract_strided_slice %16 {offsets = [0, 48], sizes = [8, 16], strides = [1, 1]} : vector<8x64xbf16> to vector<8x16xbf16>
    %92 = vector.shape_cast %91 : vector<8x16xbf16> to vector<1x8x16xbf16>
    %93 = vector.extract_strided_slice %22 {offsets = [0, 48], sizes = [8, 16], strides = [1, 1]} : vector<8x64xbf16> to vector<8x16xbf16>
    %94 = vector.shape_cast %93 : vector<8x16xbf16> to vector<1x8x16xbf16>
    "tpu.trace_start"() <{level = 10 : i32, message = "bld,bmd->blm"}> : () -> ()
    %cst_33 = arith.constant dense<0.000000e+00> : vector<1x8x8xf32>
    %95 = tpu.matmul %90, %92, %cst_33 {dimension_numbers = #tpu.dot_dimension_numbers<[2], [2], [1], [1], [0, 0, 0, 1, 1, 1], [0], [0]>} : vector<1x8x16xbf16>, vector<1x8x16xbf16>, vector<1x8x8xf32> -> vector<1x8x8xf32>
    "tpu.trace_stop"() : () -> ()
    %cst_34 = arith.constant dense<0xFF800000> : vector<1x8xf32>
    %96 = vector.multi_reduction <maximumf>, %95, %cst_34 [2] : vector<1x8x8xf32> to vector<1x8xf32>
    %97 = vector.shape_cast %96 : vector<1x8xf32> to vector<1x8x1xf32>
    %98 = vector.broadcast %97 : vector<1x8x1xf32> to vector<1x8x8xf32>
    %99 = arith.subf %95, %98 : vector<1x8x8xf32>
    %100 = math.exp %99 : vector<1x8x8xf32>
    %cst_35 = arith.constant dense<0.000000e+00> : vector<1x8xf32>
    %101 = vector.multi_reduction <add>, %100, %cst_35 [2] : vector<1x8x8xf32> to vector<1x8xf32>
    %102 = vector.shape_cast %101 : vector<1x8xf32> to vector<1x8x1xf32>
    %103 = tpu.reciprocal %102 {approx = true} : vector<1x8x1xf32> -> vector<1x8x1xf32>
    %104 = vector.broadcast %103 : vector<1x8x1xf32> to vector<1x8x8xf32>
    %105 = arith.mulf %100, %104 : vector<1x8x8xf32>
    %106 = arith.truncf %105 : vector<1x8x8xf32> to vector<1x8x8xbf16>
    "tpu.trace_start"() <{level = 10 : i32, message = "blm,bmd->bld"}> : () -> ()
    %cst_36 = arith.constant dense<0.000000e+00> : vector<1x8x16xf32>
    %107 = tpu.matmul %106, %94, %cst_36 {dimension_numbers = #tpu.dot_dimension_numbers<[2], [1], [1], [2], [0, 0, 0, 1, 1, 2], [0], [0]>} : vector<1x8x8xbf16>, vector<1x8x16xbf16>, vector<1x8x16xf32> -> vector<1x8x16xf32>
    "tpu.trace_stop"() : () -> ()
    %108 = vector.shape_cast %107 : vector<1x8x16xf32> to vector<8x16xf32>
    %109 = arith.truncf %108 : vector<8x16xf32> to vector<8x16xbf16>
    %c0_37 = arith.constant 0 : index
    %c48 = arith.constant 48 : index
    %110 = vector.load %arg19[%c0_37, %c48] : memref<8x64xbf16, #tpu.memory_space<vmem>>, vector<8x16xbf16>
    tpu.vector_store %arg19[%c0_37, %c48], %109 {strides = array<i32>} : memref<8x64xbf16, #tpu.memory_space<vmem>>, vector<8x16xbf16>,
    %c0_38 = arith.constant 0 : index
    %c0_39 = arith.constant 0 : index
    %111 = vector.load %arg19[%c0_38, %c0_39] : memref<8x64xbf16, #tpu.memory_space<vmem>>, vector<8x64xbf16>
    %c0_40 = arith.constant 0 : index
    %c0_41 = arith.constant 0 : index
    %112 = vector.load %arg8[%c0_40, %c0_41] : memref<64x64xbf16, #tpu.memory_space<vmem>>, vector<64x64xbf16>
    %cst_42 = arith.constant dense<0.000000e+00> : vector<8x64xf32>
    %113 = tpu.matmul %111, %112, %cst_42 {dimension_numbers = #tpu.dot_dimension_numbers<[1], [0], [0], [1], [0, 0, 1, 1], [], []>} : vector<8x64xbf16>, vector<64x64xbf16>, vector<8x64xf32> -> vector<8x64xf32>
    %c0_43 = arith.constant 0 : index
    %c0_44 = arith.constant 0 : index
    %114 = vector.load %arg9[%c0_43, %c0_44] : memref<1x64xf32, #tpu.memory_space<vmem>>, vector<1x64xf32>
    %115 = vector.broadcast %114 : vector<1x64xf32> to vector<8x64xf32>
    %116 = arith.addf %113, %115 : vector<8x64xf32>
    %c0_45 = arith.constant 0 : index
    %c0_46 = arith.constant 0 : index
    %117 = vector.load %arg10[%c0_45, %c0_46] : memref<1x64xf32, #tpu.memory_space<vmem>>, vector<1x64xf32>
    %c0_47 = arith.constant 0 : index
    %c0_48 = arith.constant 0 : index
    %118 = vector.load %arg11[%c0_47, %c0_48] : memref<1x64xf32, #tpu.memory_space<vmem>>, vector<1x64xf32>
    %cst_49 = arith.constant dense<0.000000e+00> : vector<8xf32>
    %119 = vector.multi_reduction <add>, %116, %cst_49 [1] : vector<8x64xf32> to vector<8xf32>
    %120 = vector.shape_cast %119 : vector<8xf32> to vector<8x1xf32>
    %cst_50 = arith.constant 6.400000e+01 : f32
    %121 = vector.broadcast %cst_50 : f32 to vector<8x1xf32>
    %122 = arith.divf %120, %121 : vector<8x1xf32>
    %123 = vector.broadcast %122 : vector<8x1xf32> to vector<8x64xf32>
    %124 = arith.subf %116, %123 : vector<8x64xf32>
    %125 = arith.mulf %124, %124 : vector<8x64xf32>
    %cst_51 = arith.constant dense<0.000000e+00> : vector<8xf32>
    %126 = vector.multi_reduction <add>, %125, %cst_51 [1] : vector<8x64xf32> to vector<8xf32>
    %127 = vector.shape_cast %126 : vector<8xf32> to vector<8x1xf32>
    %cst_52 = arith.constant 6.400000e+01 : f32
    %128 = vector.broadcast %cst_52 : f32 to vector<8x1xf32>
    %129 = arith.divf %127, %128 : vector<8x1xf32>
    %130 = vector.broadcast %122 : vector<8x1xf32> to vector<8x64xf32>
    %131 = arith.subf %116, %130 : vector<8x64xf32>
    %cst_53 = arith.constant 9.99999974E-6 : f32
    %132 = vector.broadcast %cst_53 : f32 to vector<8x1xf32>
    %133 = arith.addf %129, %132 : vector<8x1xf32>
    %134 = math.rsqrt %133 : vector<8x1xf32>
    %135 = vector.broadcast %134 : vector<8x1xf32> to vector<8x64xf32>
    %136 = arith.mulf %131, %135 : vector<8x64xf32>
    %137 = vector.broadcast %117 : vector<1x64xf32> to vector<8x64xf32>
    %138 = arith.mulf %136, %137 : vector<8x64xf32>
    %139 = vector.broadcast %118 : vector<1x64xf32> to vector<8x64xf32>
    %140 = arith.addf %138, %139 : vector<8x64xf32>
    %141 = arith.addf %140, %1 : vector<8x64xf32>
    %142 = arith.truncf %141 : vector<8x64xf32> to vector<8x64xbf16>
    %c0_54 = arith.constant 0 : index
    %c0_55 = arith.constant 0 : index
    %143 = vector.load %arg12[%c0_54, %c0_55] : memref<64x128xbf16, #tpu.memory_space<vmem>>, vector<64x128xbf16>
    %cst_56 = arith.constant dense<0.000000e+00> : vector<8x128xf32>
    %144 = tpu.matmul %142, %143, %cst_56 {dimension_numbers = #tpu.dot_dimension_numbers<[1], [0], [0], [1], [0, 0, 1, 1], [], []>} : vector<8x64xbf16>, vector<64x128xbf16>, vector<8x128xf32> -> vector<8x128xf32>
    %c0_57 = arith.constant 0 : index
    %c0_58 = arith.constant 0 : index
    %145 = vector.load %arg13[%c0_57, %c0_58] : memref<1x128xf32, #tpu.memory_space<vmem>>, vector<1x128xf32>
    %146 = vector.broadcast %145 : vector<1x128xf32> to vector<8x128xf32>
    %147 = arith.addf %144, %146 : vector<8x128xf32>
    %cst_59 = arith.constant 5.000000e-01 : f32
    %148 = vector.broadcast %cst_59 : f32 to vector<8x128xf32>
    %149 = arith.mulf %148, %147 : vector<8x128xf32>
    %cst_60 = arith.constant 0.707106769 : f32
    %150 = vector.broadcast %cst_60 : f32 to vector<8x128xf32>
    %151 = arith.mulf %147, %150 : vector<8x128xf32>
    %152 = math.erf %151 : vector<8x128xf32>
    %cst_61 = arith.constant 1.000000e+00 : f32
    %153 = vector.broadcast %cst_61 : f32 to vector<8x128xf32>
    %154 = arith.addf %153, %152 : vector<8x128xf32>
    %155 = arith.mulf %149, %154 : vector<8x128xf32>
    %156 = arith.truncf %155 : vector<8x128xf32> to vector<8x128xbf16>
    %c0_62 = arith.constant 0 : index
    %c0_63 = arith.constant 0 : index
    %157 = vector.load %arg14[%c0_62, %c0_63] : memref<128x64xbf16, #tpu.memory_space<vmem>>, vector<128x64xbf16>
    %cst_64 = arith.constant dense<0.000000e+00> : vector<8x64xf32>
    %158 = tpu.matmul %156, %157, %cst_64 {dimension_numbers = #tpu.dot_dimension_numbers<[1], [0], [0], [1], [0, 0, 1, 1], [], []>} : vector<8x128xbf16>, vector<128x64xbf16>, vector<8x64xf32> -> vector<8x64xf32>
    %c0_65 = arith.constant 0 : index
    %c0_66 = arith.constant 0 : index
    %159 = vector.load %arg15[%c0_65, %c0_66] : memref<1x64xf32, #tpu.memory_space<vmem>>, vector<1x64xf32>
    %160 = vector.broadcast %159 : vector<1x64xf32> to vector<8x64xf32>
    %161 = arith.addf %158, %160 : vector<8x64xf32>
    %c0_67 = arith.constant 0 : index
    %c0_68 = arith.constant 0 : index
    %162 = vector.load %arg16[%c0_67, %c0_68] : memref<1x64xf32, #tpu.memory_space<vmem>>, vector<1x64xf32>
    %c0_69 = arith.constant 0 : index
    %c0_70 = arith.constant 0 : index
    %163 = vector.load %arg17[%c0_69, %c0_70] : memref<1x64xf32, #tpu.memory_space<vmem>>, vector<1x64xf32>
    %cst_71 = arith.constant dense<0.000000e+00> : vector<8xf32>
    %164 = vector.multi_reduction <add>, %161, %cst_71 [1] : vector<8x64xf32> to vector<8xf32>
    %165 = vector.shape_cast %164 : vector<8xf32> to vector<8x1xf32>
    %cst_72 = arith.constant 6.400000e+01 : f32
    %166 = vector.broadcast %cst_72 : f32 to vector<8x1xf32>
    %167 = arith.divf %165, %166 : vector<8x1xf32>
    %168 = vector.broadcast %167 : vector<8x1xf32> to vector<8x64xf32>
    %169 = arith.subf %161, %168 : vector<8x64xf32>
    %170 = arith.mulf %169, %169 : vector<8x64xf32>
    %cst_73 = arith.constant dense<0.000000e+00> : vector<8xf32>
    %171 = vector.multi_reduction <add>, %170, %cst_73 [1] : vector<8x64xf32> to vector<8xf32>
    %172 = vector.shape_cast %171 : vector<8xf32> to vector<8x1xf32>
    %cst_74 = arith.constant 6.400000e+01 : f32
    %173 = vector.broadcast %cst_74 : f32 to vector<8x1xf32>
    %174 = arith.divf %172, %173 : vector<8x1xf32>
    %175 = vector.broadcast %167 : vector<8x1xf32> to vector<8x64xf32>
    %176 = arith.subf %161, %175 : vector<8x64xf32>
    %cst_75 = arith.constant 9.99999974E-6 : f32
    %177 = vector.broadcast %cst_75 : f32 to vector<8x1xf32>
    %178 = arith.addf %174, %177 : vector<8x1xf32>
    %179 = math.rsqrt %178 : vector<8x1xf32>
    %180 = vector.broadcast %179 : vector<8x1xf32> to vector<8x64xf32>
    %181 = arith.mulf %176, %180 : vector<8x64xf32>
    %182 = vector.broadcast %162 : vector<1x64xf32> to vector<8x64xf32>
    %183 = arith.mulf %181, %182 : vector<8x64xf32>
    %184 = vector.broadcast %163 : vector<1x64xf32> to vector<8x64xf32>
    %185 = arith.addf %183, %184 : vector<8x64xf32>
    %186 = arith.addf %185, %141 : vector<8x64xf32>
    %187 = vector.shape_cast %186 : vector<8x64xf32> to vector<1x8x64xf32>
    %c0_76 = arith.constant 0 : index
    %c0_77 = arith.constant 0 : index
    %c0_78 = arith.constant 0 : index
    %188 = vector.load %arg18[%c0_76, %c0_77, %c0_78] : memref<1x8x64xf32, #tpu.memory_space<vmem>>, vector<1x8x64xf32>
    tpu.vector_store %arg18[%c0_76, %c0_77, %c0_78], %187 {strides = array<i32>} : memref<1x8x64xf32, #tpu.memory_space<vmem>>, vector<1x8x64xf32>,
    return
  }
  func.func @transform_0(%arg0: i32) -> (i32, i32, i32) {
    %c0_i32 = arith.constant 0 : i32
    %c0_i32_0 = arith.constant 0 : i32
    %c0_i32_1 = arith.constant 0 : i32
    return %arg0, %c0_i32, %c0_i32_0 : i32, i32, i32
  }
  func.func @transform_1(%arg0: i32) -> (i32, i32) {
    %c0_i32 = arith.constant 0 : i32
    %c0_i32_0 = arith.constant 0 : i32
    %c0_i32_1 = arith.constant 0 : i32
    return %c0_i32, %c0_i32_0 : i32, i32
  }
  func.func @transform_2(%arg0: i32) -> (i32, i32) {
    %c0_i32 = arith.constant 0 : i32
    %c0_i32_0 = arith.constant 0 : i32
    %c0_i32_1 = arith.constant 0 : i32
    return %c0_i32, %c0_i32_0 : i32, i32
  }
  func.func @transform_3(%arg0: i32) -> (i32, i32) {
    %c0_i32 = arith.constant 0 : i32
    %c0_i32_0 = arith.constant 0 : i32
    %c0_i32_1 = arith.constant 0 : i32
    return %c0_i32, %c0_i32_0 : i32, i32
  }
  func.func @transform_4(%arg0: i32) -> (i32, i32) {
    %c0_i32 = arith.constant 0 : i32
    %c0_i32_0 = arith.constant 0 : i32
    %c0_i32_1 = arith.constant 0 : i32
    return %c0_i32, %c0_i32_0 : i32, i32
  }
  func.func @transform_5(%arg0: i32) -> (i32, i32) {
    %c0_i32 = arith.constant 0 : i32
    %c0_i32_0 = arith.constant 0 : i32
    %c0_i32_1 = arith.constant 0 : i32
    return %c0_i32, %c0_i32_0 : i32, i32
  }
  func.func @transform_6(%arg0: i32) -> (i32, i32) {
    %c0_i32 = arith.constant 0 : i32
    %c0_i32_0 = arith.constant 0 : i32
    %c0_i32_1 = arith.constant 0 : i32
    return %c0_i32, %c0_i32_0 : i32, i32
  }
  func.func @transform_7(%arg0: i32) -> (i32, i32) {
    %c0_i32 = arith.constant 0 : i32
    %c0_i32_0 = arith.constant 0 : i32
    %c0_i32_1 = arith.constant 0 : i32
    return %c0_i32, %c0_i32_0 : i32, i32
  }
  func.func @transform_8(%arg0: i32) -> (i32, i32) {
    %c0_i32 = arith.constant 0 : i32
    %c0_i32_0 = arith.constant 0 : i32
    %c0_i32_1 = arith.constant 0 : i32
    return %c0_i32, %c0_i32_0 : i32, i32
  }
  func.func @transform_9(%arg0: i32) -> (i32, i32) {
    %c0_i32 = arith.constant 0 : i32
    %c0_i32_0 = arith.constant 0 : i32
    %c0_i32_1 = arith.constant 0 : i32
    return %c0_i32, %c0_i32_0 : i32, i32
  }
  func.func @transform_10(%arg0: i32) -> (i32, i32) {
    %c0_i32 = arith.constant 0 : i32
    %c0_i32_0 = arith.constant 0 : i32
    %c0_i32_1 = arith.constant 0 : i32
    return %c0_i32, %c0_i32_0 : i32, i32
  }
  func.func @transform_11(%arg0: i32) -> (i32, i32) {
    %c0_i32 = arith.constant 0 : i32
    %c0_i32_0 = arith.constant 0 : i32
    %c0_i32_1 = arith.constant 0 : i32
    return %c0_i32, %c0_i32_0 : i32, i32
  }
  func.func @transform_12(%arg0: i32) -> (i32, i32) {
    %c0_i32 = arith.constant 0 : i32
    %c0_i32_0 = arith.constant 0 : i32
    %c0_i32_1 = arith.constant 0 : i32
    return %c0_i32, %c0_i32_0 : i32, i32
  }
  func.func @transform_13(%arg0: i32) -> (i32, i32) {
    %c0_i32 = arith.constant 0 : i32
    %c0_i32_0 = arith.constant 0 : i32
    %c0_i32_1 = arith.constant 0 : i32
    return %c0_i32, %c0_i32_0 : i32, i32
  }
  func.func @transform_14(%arg0: i32) -> (i32, i32) {
    %c0_i32 = arith.constant 0 : i32
    %c0_i32_0 = arith.constant 0 : i32
    %c0_i32_1 = arith.constant 0 : i32
    return %c0_i32, %c0_i32_0 : i32, i32
  }
  func.func @transform_15(%arg0: i32) -> (i32, i32) {
    %c0_i32 = arith.constant 0 : i32
    %c0_i32_0 = arith.constant 0 : i32
    %c0_i32_1 = arith.constant 0 : i32
    return %c0_i32, %c0_i32_0 : i32, i32
  }
  func.func @transform_16(%arg0: i32) -> (i32, i32) {
    %c0_i32 = arith.constant 0 : i32
    %c0_i32_0 = arith.constant 0 : i32
    %c0_i32_1 = arith.constant 0 : i32
    return %c0_i32, %c0_i32_0 : i32, i32
  }
  func.func @transform_17(%arg0: i32) -> (i32, i32, i32) {
    %c0_i32 = arith.constant 0 : i32
    %c0_i32_0 = arith.constant 0 : i32
    %c0_i32_1 = arith.constant 0 : i32
    return %arg0, %c0_i32, %c0_i32_0 : i32, i32, i32
  }
}

</mosaic_0001>

<bundles_post_ra>
// kernel: transformer_forward.3
= control target key start
LH: loop header
LB: loop body
LE: loop exit
PB: predicated region body
PF: predicated region fallthrough
CT: control target
= control target key end

     0   :  { %s2507_s0 = inlined_call_operand.vmem [shape: f32[2,8,64], index: 0, kind: input, shape index: {}]   ;;  %s2508_s1 = inlined_call_operand.vmem [shape: bf16[64,64], index: 1, kind: input, shape index: {}]   ;;  %s2509_s2 = inlined_call_operand.vmem [shape: f32[1,64], index: 2, kind: input, shape index: {}]   ;;  %s2510_s3 = inlined_call_operand.vmem [shape: bf16[64,64], index: 3, kind: input, shape index: {}]   ;;  %s2511_s4 = inlined_call_operand.vmem [shape: f32[1,64], index: 4, kind: input, shape index: {}]   ;;  %s2512_s5 = inlined_call_operand.vmem [shape: bf16[64,64], index: 5, kind: input, shape index: {}]   ;;  %s2513_s6 = inlined_call_operand.vmem [shape: f32[1,64], index: 6, kind: input, shape index: {}]   ;;  %s2514_s7 = inlined_call_operand.vmem [shape: bf16[64,64], index: 7, kind: input, shape index: {}]   ;;  %s2515_s8 = inlined_call_operand.vmem [shape: f32[1,64], index: 8, kind: input, shape index: {}]   ;;  %s2516_s9 = inlined_call_operand.vmem [shape: f32[1,64], index: 9, kind: input, shape index: {}]   ;;  %s2517_s10 = inlined_call_operand.vmem [shape: f32[1,64], index: 10, kind: input, shape index: {}]   ;;  %s2518_s11 = inlined_call_operand.vmem [shape: bf16[64,128], index: 11, kind: input, shape index: {}]   ;;  %s2519_s12 = inlined_call_operand.vmem [shape: f32[1,128], index: 12, kind: input, shape index: {}]   ;;  %s2520_s13 = inlined_call_operand.vmem [shape: bf16[128,64], index: 13, kind: input, shape index: {}]   ;;  %s2521_s14 = inlined_call_operand.vmem [shape: f32[1,64], index: 14, kind: input, shape index: {}]   ;;  %s2522_s15 = inlined_call_operand.vmem [shape: f32[1,64], index: 15, kind: input, shape index: {}]   ;;  %s2523_s16 = inlined_call_operand.vmem [shape: f32[1,64], index: 16, kind: input, shape index: {}]   ;;  %s2524_s17 = inlined_call_operand.hbm [shape: f32[2,8,64], index: 17, kind: output, shape index: {}]  }
   0x1   :  { %2532 = sst [smem:[#allocation12_spill]] %s2507_s0 }
   0x2   :  { %2533 = sst [smem:[#allocation13_spill]] %s2508_s1 }
   0x3   :  { %2534 = sst [smem:[#allocation14_spill]] %s2509_s2 }
   0x4   :  { %22 = vsyncpa [#allocation4], 0 }
   0x5   :  { %24 = vsyncpa [#allocation4 + $0x1], 0  ;;  %s2183_s24 = smov 0   ;;  %s2185_s25 = smov 0  }
   0x6   :  { %s2187_s26 = smov 0   ;;  %s2189_s27 = smov 0  }
   0x7 LB: > { %2535 = sst [smem:[#allocation6_spill]] %s2070_s24  ;;  %s2204_s28 = sadd.s32 4294967295, %s2082_s27   ;;  %s2082_s27 = sphi %s2189_s27, %s2549_s27   ;;  %s2078_s26 = sphi %s2187_s26, %s2551_s26   ;;  %s2074_s25 = sphi %s2185_s25, %s2553_s25   ;;  %s2070_s24 = sphi %s2183_s24, %s2552_s24  }
   0x8   : > { %2536 = sst [smem:[#allocation7_spill]] %s2078_s26  ;;  %s1680_s29 = sadd.s32 4294967294, %s2082_s27  }
   0x9   : > { %2537 = sst [smem:[#allocation8_spill]] %s2082_s27  ;;  %s2208_s0 = sadd.s32 1, %s2082_s27  }
   0xa   : > { %2538 = sst [smem:[#allocation9_spill]] %s2208_s0  ;;  %s399_s30 = sadd.s32 1, %s2078_s26 }
   0xb   : > { %s396_s18 = ssub.s32 %s2082_s27, %s2208_s0  ;;  %p409_p0 = scmp.ne.s32.totalorder %s2078_s26, %s2074_s25 }
   0xc   : > { %p397_p1 = scmp.eq.s32.totalorder %s396_s18, 0  ;;  %p410_p2 = scmp.eq.s32.totalorder %s2204_s28, 1 }
   0xd   : > { %p415_p3 = scmp.ne.s32.totalorder %s2074_s25, %s2070_s24  ;;  %p416_p4 = scmp.eq.s32.totalorder %s1680_s29, 1 }
   0xe   : > { %s2219_s19 = scalar_select %p397_p1, %s2078_s26, %s399_s30  }
   0xf   : > { %p2221_p5 = por %p410_p2, %p409_p0  ;;  %p2225_p6 = por %p416_p4, %p415_p3 }
  0x10   : > { %2539 = sst [smem:[#allocation10_spill]] %s2219_s19  ;;  %p1683_p7 = scmp.ge.s32.totalorder %s2082_s27, 1 }
  0x11   : > { %s2541_s20 = scalar_select %p2225_p6, 1, 0 }
  0x12   : > { %p489_p8 = scmp.lt.s32.totalorder %s2082_s27, 3 }
  0x13   : > { %2542 = sst [smem:[#allocation11_spill]] %s2541_s20 }
  0x14   : > { %p490_p9 = pnand %p1683_p7, %p489_p8 }
  0x15   : > { %s2543_s23 = sld [smem:[#allocation13_spill]] (!%p490_p9)  ;;  %p540_p10 = scmp.lt.s32.totalorder (!%p490_p9), %s2204_s28, 1 }
  0x16   : > { %493 = sbr.rel (%p490_p9) target bundleno = 2463 (0x99f), region = 88  ;;  %s2544_s26 = sld [smem:[#allocation12_spill]] (!%p490_p9) }
  0x17   : > { %s2545_s2 = sld [smem:[#allocation14_spill]] (!%p490_p9)  ;;  %s2086_s22 = smov (!%p490_p9), 96  }
  0x18   : > { %s2087_s29 = smov (!%p490_p9), 112   ;;  %s2088_s30 = smov (!%p490_p9), 80  }
  0x19   : > { %s2089_s20 = smov (!%p490_p9), 16   ;;  %s2090_s21 = smov (!%p490_p9), 32  }
  0x1a   : > { %s537_s24 = sand.u32 (!%p490_p9), 1, %s2074_s25  }
  0x1b   : > { %v1972_v0 = vld [vmem:[%s2543_s23 + $0x18] sm:$0xff]   ;;  %v2084_v1 = vmov 0.0   ;;  %v1973_v2 = vld [vmem:[%s2543_s23 + $0x10] sm:$0xff]   ;;  %vm2085_vm0 = vmmov 0   ;;  %s541_s18 = scalar_select %p540_p10, %s2204_s28, 1  ;;  %v1974_v3 = vld [vmem:[%s2543_s23 + $0x8] sm:$0xff]  }
  0x1c   : > { %1797 = vmatprep.subr.bf16.mxu1 %v2084_v1  ;;  %1821 = vmatprep.subr.bf16.mxu0 %v2084_v1  ;;  %v1975_v4 = vld [vmem:[%s2543_s23] sm:$0xff]   ;;  %vm586_vm1 = vcmask 523264   ;;  %v1976_v6 = vld [vmem:[%s2510_s3 + $0x18] sm:$0xff]   ;;  %v1977_v8 = vld [vmem:[%s2510_s3 + $0x10] sm:$0xff]   ;;  %vm792_vm2 = vcmask 130048   ;;  %vm855_vm3 = vcmask 1043456  }
  0x1d   : > { %1798 = vmatpush3.bf16.msra.mxu1 %v1972_v0  ;;  %1805 = vmatprep.mubr.msk.bf16.mxu1 %vm2085_vm0, %v2084_v1  ;;  %s1685_s19 = sshll.u32 %s541_s18, 3  ;;  %v1978_v9 = vld [vmem:[%s2510_s3 + $0x8] sm:$0xff]   ;;  %v1979_v10 = vld [vmem:[%s2510_s3] sm:$0xff]   ;;  %v1980_v11 = vld [vmem:[%s2512_s5 + $0x18] sm:$0xff]   ;;  %vm839_vm4 = vcmask 64512   ;;  %vm900_vm5 = vcmask 125952  }
  0x1e   : > { %1799 = vmatprep.subr.bf16.mxu1 %v2084_v1  ;;  %1829 = vmatprep.mubr.msk.bf16.mxu0 %vm2085_vm0, %v2084_v1  ;;  %s543_s0 = scalar_lea.vmem %s2544_s26, %s1685_s19  ;;  %v1981_v12 = vld [vmem:[%s2512_s5 + $0x10] sm:$0xff]   ;;  %v1982_v13 = vld [vmem:[%s2512_s5 + $0x8] sm:$0xff]   ;;  %v1983_v14 = vld [vmem:[%s2512_s5] sm:$0xff]   ;;  %s2091_s26 = smov 48   ;;  %vm1022_vm6 = vcmask 257152   ;;  %vm1141_vm7 = vcmask 388352  }
  0x1f   : > { %v2256_v5 = vld [vmem:[%s543_s0] sm:$0xff]  ;;  %1822 = vmatpush3.bf16.msra.mxu0 %v1980_v11  ;;  %vm1260_vm8 = vcmask 519552   ;;  %s1684_s27 = sshll.u32 %s537_s24, 3  ;;  %s1608_s0 = scalar_lea.sflag [#allocation4], %s537_s24 }
  0x20   : > { %v546_v7 = vpack.c.bf16 %v2256_v5, %v2256_v5  ;;  %1823 = vmatprep.subr.bf16.mxu0 %v2084_v1  ;;  %v1686_v19 = vld [vmem:[%s2545_s2] ss:$0 sm:$0xff]  ;;  %s2092_s18 = smov [#allocation3]  }
  0x21   : > { %1800 = vmatpush3.bf16.msra.mxu1 %v1973_v2  ;;  %v1692_v20 = vld [vmem:[%s2511_s4] ss:$0 sm:$0xff] }
  0x22   : > { %1801 = vmatprep.subr.bf16.mxu1 %v2084_v1  ;;  %v1698_v31 = vld [vmem:[%s2513_s6] ss:$0 sm:$0xff] }
  0x23   : > { %1824 = vmatpush3.bf16.msra.mxu0 %v1981_v12 }
  0x24   : > { %1825 = vmatprep.subr.bf16.mxu0 %v2084_v1 }
  0x25   : > { %1802 = vmatpush3.bf16.msra.mxu1 %v1974_v3 }
  0x26   : > { %1803 = vmatprep.subr.bf16.mxu1 %v2084_v1 }
  0x27   : > { %1826 = vmatpush3.bf16.msra.mxu0 %v1982_v13 }
  0x28   : > { %1827 = vmatprep.subr.bf16.mxu0 %v2084_v1 }
  0x29   : > { %1804 = vmatpush3.bf16.msra.mxu1 %v1975_v4 }
  0x2a   : > { %1809 = vmatprep.subr.bf16.mxu1 %v2084_v1 }
  0x2b   : > { %1828 = vmatpush3.bf16.msra.mxu0 %v1983_v14 }
  0x2c   : > { %1806 = vmatmul.mubr.msk.bf16.vlgmr.msra.gmra.mxu1 %vm586_vm1, %v546_v7  ;;  %1845 = vmatprep.subr.bf16.mxu0 %v2084_v1 }
  0x2d   : > { %1810 = vmatpush3.bf16.msra.mxu1 %v1976_v6  ;;  %1817 = vmatprep.mubr.msk.bf16.mxu1 %vm2085_vm0, %v2084_v1 }
  0x2e   : > { %1811 = vmatprep.subr.bf16.mxu1 %v2084_v1  ;;  %1830 = vmatmul.mubr.msk.bf16.vlgmr.msra.gmra.mxu0 %vm586_vm1, %v546_v7 }
  0x2f   : > { %1847 = vmatprep.mubr.msk.bf16.mxu0 %vm2085_vm0, %v2084_v1 }
  0x31   : > { %1812 = vmatpush3.bf16.msra.mxu1 %v1977_v8 }
  0x32   : > { %1813 = vmatprep.subr.bf16.mxu1 %v2084_v1 }
  0x35   : > { %1814 = vmatpush3.bf16.msra.mxu1 %v1978_v9 }
  0x36   : > { %1815 = vmatprep.subr.bf16.mxu1 %v2084_v1 }
  0x39   : > { %1816 = vmatpush3.bf16.msra.mxu1 %v1979_v10 }
  0x3a   : > { %1833 = vmatprep.subr.bf16.mxu1 %v2084_v1 }
  0x3c   : > { %1818 = vmatmul.mubr.msk.bf16.vlgmr.msra.gmra.mxu1 %vm586_vm1, %v546_v7 }
  0x3d   : > { %1835 = vmatprep.mubr.msk.bf16.mxu1 %vm2085_vm0, %v2084_v1 }
  0xec   : > { %v624_v15 = vpop.f32.mrf.mxu1 }
  0xed   : > { %v625_v21 = vadd.f32 %v1686_v19, %v624_v15 }
  0xee   : > { %v1807_v16 = vpop.f32.mrf.mxu1  ;;  %v785_v32 = vpop.f32.mrf.mxu0 }
  0xef   : > { %v630_v25 = vmul.f32 0.25, %v625_v21  ;;  %v786_v33 = vadd.f32 %v1698_v31, %v785_v32 }
  0xf0   : > { %v627_v17 = vpop.f32.mrf.mxu1  ;;  %v1831_v34 = vpop.f32.mrf.mxu0 }
  0xf1   : > { %v631_v30 = vpack.c.bf16 %v630_v25, %v630_v25  ;;  %v2323_v35 = vpack.c.bf16 %v786_v33, %v786_v33 }
  0xf2   : > { %v1808_v18 = vpop.f32.mrf.mxu1  ;;  %v788_v36 = vpop.f32.mrf.mxu0 }
  0xf3   : > { %v857_v37 = vsel %vm855_vm3, %v2323_v35, 0 }
  0xf4   : > { %v1832_v38 = vpop.f32.mrf.mxu0 }
  0xfc   : > { %v705_v22 = vpop.f32.mrf.mxu1 }
  0xfd   : > { %v706_v23 = vadd.f32 %v1692_v20, %v705_v22 }
  0xfe   : > { %v1819_v24 = vpop.f32.mrf.mxu1 }
  0xff   : > { %v711_v26 = vpack.c.bf16 %v706_v23, %v706_v23 }
 0x100   : > { %v708_v27 = vpop.f32.mrf.mxu1 }
 0x101   : > { %1026 = vrot.lane.b32.xlu1 %v711_v26, %s2086_s22  ;;  %906 = vrot.lane.b32.xlu0 %v711_v26, %s2087_s29  ;;  %v797_v28 = vsel %vm792_vm2, %v711_v26, 0 }
 0x102   : > { %v1820_v29 = vpop.f32.mrf.mxu1  ;;  %1834 = vmatpush3.bf16.xpose.msra.mxu1 %v797_v28 }
 0x103   : > { %1839 = vmatprep.subr.bf16.mxu1 %v2084_v1 }
 0x105   : > { %1024 = vrot.lane.b32.xlu1 %v631_v30, %s2086_s22  ;;  %903 = vrot.lane.b32.xlu0 %v631_v30, %s2087_s29 }
 0x109   : > { %1143 = vrot.lane.b32.xlu1 %v631_v30, %s2088_s30  ;;  %1145 = vrot.lane.b32.xlu0 %v711_v26, %s2088_s30 }
 0x10a   : > { %1836 = vmatmul.mubr.msk.bf16.vlgmr.msra.gmra.mxu1 %vm792_vm2, %v631_v30 }
 0x10b   : > { %1841 = vmatprep.mubr.msk.bf16.mxu1 %vm2085_vm0, %v2084_v1  ;;  %1840 = vmatpush3.bf16.msra.mxu1 %v857_v37 }
 0x10c   : > { %1851 = vmatprep.subr.bf16.mxu1 %v2084_v1 }
 0x173   : > { %v907_v39 = vpop.permute.xlu0 %906  ;;  %v1027_v41 = vpop.permute.xlu1 %1026 }
 0x174   : > { %v912_v40 = vsel %vm792_vm2, %v907_v39, 0  ;;  %v1032_v43 = vsel %vm792_vm2, %v1027_v41, 0 }
 0x175   : > { %1846 = vmatpush3.bf16.xpose.msra.mxu0 %v912_v40 }
 0x176   : > { %1857 = vmatprep.subr.bf16.mxu0 %v2084_v1 }
 0x177   : > { %v904_v42 = vpop.permute.xlu0 %903  ;;  %v1025_v45 = vpop.permute.xlu1 %1024 }
 0x17b   : > { %v1146_v44 = vpop.permute.xlu0 %1145  ;;  %v1144_v47 = vpop.permute.xlu1 %1143 }
 0x17c   : > { %1848 = vmatmul.mubr.msk.bf16.vlgmr.msra.gmra.mxu0 %vm792_vm2, %v904_v42  ;;  %v1151_v46 = vsel %vm792_vm2, %v1146_v44, 0 }
 0x17d   : > { %1858 = vmatpush3.bf16.xpose.msra.mxu0 %v1032_v43  ;;  %1859 = vmatprep.mubr.msk.bf16.mxu0 %vm2085_vm0, %v2084_v1 }
 0x17e   : > { %1869 = vmatprep.subr.bf16.mxu0 %v2084_v1 }
 0x184   : > { %1860 = vmatmul.mubr.msk.bf16.vlgmr.msra.gmra.mxu0 %vm792_vm2, %v1025_v45 }
 0x185   : > { %1870 = vmatpush3.bf16.xpose.msra.mxu0 %v1151_v46  ;;  %1871 = vmatprep.mubr.msk.bf16.mxu0 %vm2085_vm0, %v2084_v1 }
 0x186   : > { %1881 = vmatprep.subr.bf16.mxu0 %v2084_v1 }
 0x18c   : > { %1872 = vmatmul.mubr.msk.bf16.vlgmr.msra.gmra.mxu0 %vm792_vm2, %v1144_v47 }
 0x18d   : > { %1889 = vmatprep.mubr.msk.bf16.mxu0 %vm2085_vm0, %v2084_v1 }
 0x1ca   : > { %v833_v48 = vpop.f32.mrf.mxu1 }
 0x1cb   : > { %v840_v49 = vsel %vm839_vm4, %v833_v48, -inf }
 0x1cc   : > { %841 = vmax.xlane.f32.xlu0 %v840_v49  ;;  %v1837_v50 = vpop.f32.mrf.mxu1 }
 0x1ce   : > { %v836_v51 = vpop.f32.mrf.mxu1 }
 0x1d0   : > { %v1838_v52 = vpop.f32.mrf.mxu1 }
 0x23c   : > { %v948_v53 = vpop.f32.mrf.mxu0 }
 0x23d   : > { %v954_v54 = vsel %vm839_vm4, %v948_v53, -inf }
 0x23e   : > { %955 = vmax.xlane.f32.xlu1 %v954_v54  ;;  %v1849_v55 = vpop.f32.mrf.mxu0 }
 0x23f   : > { %v1985_v55 = vld [vmem:[%s2514_s7 + $0x10] sm:$0xff]  }
 0x240   : > { %v951_v56 = vpop.f32.mrf.mxu0 }
 0x242   : > { %v1850_v57 = vpop.f32.mrf.mxu0 }
 0x244   : > { %v1068_v58 = vpop.f32.mrf.mxu0 }
 0x245   : > { %v1074_v59 = vsel %vm839_vm4, %v1068_v58, -inf }
 0x246   : > { %v1861_v60 = vpop.f32.mrf.mxu0  ;;  %1075 = vmax.xlane.f32.xlu0 %v1074_v59 }
 0x247   : > { %v1986_v60 = vld [vmem:[%s2514_s7 + $0x8] sm:$0xff]  }
 0x248   : > { %v1071_v61 = vpop.f32.mrf.mxu0 }
 0x24a   : > { %v1862_v62 = vpop.f32.mrf.mxu0 }
 0x24b   : > { %v1987_v62 = vld [vmem:[%s2514_s7] sm:$0xff]  }
 0x24c   : > { %v1187_v63 = vpop.f32.mrf.mxu0 }
 0x24d   : > { %v1193_v0 = vsel %vm839_vm4, %v1187_v63, -inf }
 0x24e   : > { %v1873_v2 = vpop.f32.mrf.mxu0  ;;  %1194 = vmax.xlane.f32.xlu0 %v1193_v0 }
 0x250   : > { %v1190_v3 = vpop.f32.mrf.mxu0 }
 0x252   : > { %v1874_v4 = vpop.f32.mrf.mxu0 }
 0x255   : > { %v842_v6 = vpop.xlane.xlu0 %841 }
 0x256   : > { %v843_v7 = vsub.f32 %v833_v48, %v842_v6 }
 0x258   : > { %v844_v8 = vmul.f32 1.442695, %v843_v7 }
 0x25a   : > { %2000 = vpow2.f32 %v844_v8 }
 0x267   : > { %v2001_v9 = vpop.eup %2000 }
 0x268   : > { %v846_v10 = vsel %vm839_vm4, %v2001_v9, 0.0 }
 0x269   : > { %847 = vadd.xlane.f32.xlu1 %v846_v10 }
 0x27a   : > { %967 = vrot.lane.b32.xlu1 %v2323_v35, %s2087_s29  ;;  %s1741_s29 = sshll.u32 %s2204_s28, 7  ;;  %s2026_s28 = sshll.u32 %s2092_s18, 4  ;;  %s2027_s28 = int_to_ptr.vmem [resolvable:$false] %s2026_s28 }
 0x27b   : > { %s1619_s2 = scalar_lea.hbm %s2524_s17, %s1741_s29 }
 0x2c7   : > { %v956_v11 = vpop.xlane.xlu1 %955 }
 0x2c8   : > { %v957_v12 = vsub.f32 %v948_v53, %v956_v11  ;;  %v1984_v53 = vld [vmem:[%s2514_s7 + $0x18] sm:$0xff]  }
 0x2c9   : > { %1882 = vmatpush3.bf16.msra.mxu0 %v1984_v53 }
 0x2ca   : > { %v958_v13 = vmul.f32 1.442695, %v957_v12  ;;  %1883 = vmatprep.subr.bf16.mxu0 %v2084_v1 }
 0x2cc   : > { %2002 = vpow2.f32 %v958_v13 }
 0x2cd   : > { %1884 = vmatpush3.bf16.msra.mxu0 %v1985_v55 }
 0x2ce   : > { %1885 = vmatprep.subr.bf16.mxu0 %v2084_v1 }
 0x2cf   : > { %v1076_v14 = vpop.xlane.xlu0 %1075 }
 0x2d0   : > { %v1077_v15 = vsub.f32 %v1068_v58, %v1076_v14  ;;  %v1715_v14 = vld [vmem:[%s2515_s8] ss:$0 sm:$0xff] }
 0x2d1   : > { %1886 = vmatpush3.bf16.msra.mxu0 %v1986_v60 }
 0x2d2   : > { %v1078_v16 = vmul.f32 1.442695, %v1077_v15  ;;  %1887 = vmatprep.subr.bf16.mxu0 %v2084_v1 }
 0x2d4   : > { %2004 = vpow2.f32 %v1078_v16 }
 0x2d5   : > { %1888 = vmatpush3.bf16.msra.mxu0 %v1987_v62 }
 0x2d6   : > { %1905 = vmatprep.subr.bf16.mxu0 %v2084_v1 }
 0x2d7   : > { %v1195_v17 = vpop.xlane.xlu0 %1194 }
 0x2d8   : > { %v1196_v18 = vsub.f32 %v1187_v63, %v1195_v17 }
 0x2d9   : > { %v2003_v19 = vpop.eup %2002 }
 0x2da   : > { %v1197_v20 = vmul.f32 1.442695, %v1196_v18  ;;  %v960_v21 = vsel %vm839_vm4, %v2003_v19, 0.0 }
 0x2db   : > { %961 = vadd.xlane.f32.xlu0 %v960_v21 }
 0x2dc   : > { %2006 = vpow2.f32 %v1197_v20 }
 0x2e1   : > { %v2005_v22 = vpop.eup %2004 }
 0x2e2   : > { %v1080_v23 = vsel %vm839_vm4, %v2005_v22, 0.0 }
 0x2e3   : > { %1081 = vadd.xlane.f32.xlu1 %v1080_v23 }
 0x2e9   : > { %v2007_v24 = vpop.eup %2006 }
 0x2ea   : > { %v1199_v25 = vsel %vm839_vm4, %v2007_v24, 0.0 }
 0x2eb   : > { %1200 = vadd.xlane.f32.xlu0 %v1199_v25 }
 0x2f2   : > { %v848_v26 = vpop.xlane.xlu1 %847 }
 0x2f3   : > { %2008 = vrcp.f32 %v848_v26  ;;  %v1988_v26 = vld [vmem:[%s2518_s11 + $0x18] sm:$0xff]  }
 0x2f4   : > { %1205 = vrot.lane.b32.xlu1 %v2323_v35, %s2088_s30  ;;  %s539_s30 = scalar_lea.vmem [#allocation3], %s1684_s27  ;;  %s2028_s27 = scalar_lea.vmem %s2027_s28, 256 }
 0x2f6   : > { %v968_v29 = vpop.permute.xlu1 %967 }
 0x2f7   : > { %v973_v31 = vsel %vm855_vm3, %v968_v29, 0  ;;  %v1991_v29 = vld [vmem:[%s2518_s11] sm:$0xff]  }
 0x300   : > { %v2009_v27 = vpop.eup %2008 }
 0x301   : > { %1086 = vrot.lane.b32.xlu0 %v2323_v35, %s2086_s22  ;;  %v850_v28 = vmul.f32 %v2009_v27, %v2001_v9  ;;  %v1989_v27 = vld [vmem:[%s2518_s11 + $0x10] sm:$0xff]  }
 0x303   : > { %v851_v30 = vpack.c.bf16 %v850_v28, %v850_v28  ;;  %v1990_v28 = vld [vmem:[%s2518_s11 + $0x8] sm:$0xff]  }
 0x305   : > { %1842 = vmatmul.mubr.msk.bf16.vlgmr.msra.gmra.mxu1 %vm839_vm4, %v851_v30  ;;  %v1992_v30 = vld [vmem:[%s2520_s13 + $0x38] sm:$0xff]  }
 0x306   : > { %1852 = vmatpush3.bf16.msra.mxu1 %v973_v31  ;;  %1853 = vmatprep.mubr.msk.bf16.mxu1 %vm2085_vm0, %v2084_v1  ;;  %v1993_v31 = vld [vmem:[%s2520_s13 + $0x30] sm:$0xff]  }
 0x307   : > { %1863 = vmatprep.subr.bf16.mxu1 %v2084_v1 }
 0x364   : > { %v962_v32 = vpop.xlane.xlu0 %961 }
 0x365   : > { %2010 = vrcp.f32 %v962_v32 }
 0x36c   : > { %v1082_v33 = vpop.xlane.xlu1 %1081 }
 0x36d   : > { %2012 = vrcp.f32 %v1082_v33 }
 0x370   : > { %v1206_v42 = vpop.permute.xlu1 %1205 }
 0x371   : > { %v1211_v44 = vsel %vm855_vm3, %v1206_v42, 0 }
 0x372   : > { %v2011_v34 = vpop.eup %2010 }
 0x373   : > { %v964_v36 = vmul.f32 %v2011_v34, %v2003_v19 }
 0x374   : > { %v1201_v35 = vpop.xlane.xlu0 %1200 }
 0x375   : > { %2014 = vrcp.f32 %v1201_v35  ;;  %v965_v37 = vpack.c.bf16 %v964_v36, %v964_v36  ;;  %v1721_v35 = vld [vmem:[%s2516_s9] ss:$0 sm:$0xff] }
 0x377   : > { %1854 = vmatmul.mubr.msk.bf16.vlgmr.msra.gmra.mxu1 %vm839_vm4, %v965_v37 }
 0x378   : > { %v1087_v38 = vpop.permute.xlu0 %1086  ;;  %1865 = vmatprep.mubr.msk.bf16.mxu1 %vm2085_vm0, %v2084_v1 }
 0x379   : > { %v1092_v39 = vsel %vm855_vm3, %v1087_v38, 0  ;;  %v1722_v38 = vld [vmem:[%s2517_s10] ss:$0 sm:$0xff] }
 0x37a   : > { %v2013_v40 = vpop.eup %2012  ;;  %1864 = vmatpush3.bf16.msra.mxu1 %v1092_v39 }
 0x37b   : > { %1875 = vmatprep.subr.bf16.mxu1 %v2084_v1  ;;  %v1084_v41 = vmul.f32 %v2013_v40, %v2005_v22 }
 0x37d   : > { %v1085_v43 = vpack.c.bf16 %v1084_v41, %v1084_v41 }
 0x37f   : > { %1866 = vmatmul.mubr.msk.bf16.vlgmr.msra.gmra.mxu1 %vm839_vm4, %v1085_v43  ;;  %v1994_v43 = vld [vmem:[%s2520_s13 + $0x28] sm:$0xff]  }
 0x380   : > { %1876 = vmatpush3.bf16.msra.mxu1 %v1211_v44  ;;  %1877 = vmatprep.mubr.msk.bf16.mxu1 %vm2085_vm0, %v2084_v1  ;;  %v1995_v44 = vld [vmem:[%s2520_s13 + $0x20] sm:$0xff]  }
 0x381   : > { %1893 = vmatprep.subr.bf16.mxu1 %v2084_v1 }
 0x382   : > { %v2015_v45 = vpop.eup %2014 }
 0x383   : > { %v1203_v46 = vmul.f32 %v2015_v45, %v2007_v24  ;;  %v1997_v45 = vld [vmem:[%s2520_s13 + $0x10] sm:$0xff]  }
 0x385   : > { %v1204_v47 = vpack.c.bf16 %v1203_v46, %v1203_v46  ;;  %v1998_v46 = vld [vmem:[%s2520_s13 + $0x8] sm:$0xff]  }
 0x387   : > { %1878 = vmatmul.mubr.msk.bf16.vlgmr.msra.gmra.mxu1 %vm839_vm4, %v1204_v47  ;;  %v1999_v47 = vld [vmem:[%s2520_s13] sm:$0xff]  }
 0x388   : > { %1901 = vmatprep.mubr.msk.bf16.mxu1 %vm2085_vm0, %v2084_v1  ;;  %1894 = vmatpush3.bf16.msra.mxu1 %v1988_v26 }
 0x389   : > { %1895 = vmatprep.subr.bf16.mxu1 %v2084_v1 }
 0x38c   : > { %1896 = vmatpush3.bf16.msra.mxu1 %v1989_v27 }
 0x38d   : > { %1897 = vmatprep.subr.bf16.mxu1 %v2084_v1 }
 0x390   : > { %1898 = vmatpush3.bf16.msra.mxu1 %v1990_v28 }
 0x391   : > { %1899 = vmatprep.subr.bf16.mxu1 %v2084_v1 }
 0x394   : > { %1900 = vmatpush3.bf16.msra.mxu1 %v1991_v29 }
 0x3c5   : > { %v893_v48 = vpop.f32.mrf.mxu1 }
 0x3c6   : > { %v899_v49 = vpack.c.bf16 %v893_v48, %v893_v48  ;;  %v1723_v48 = vld [vmem:[%s2519_s12] ss:$0 sm:$0xff] }
 0x3c7   : > { %v1843_v50 = vpop.f32.mrf.mxu1 }
 0x3c8   : > { %901 = vst.msk [vmem:[#allocation2] sm:$0xf] %vm900_vm5, %v899_v49 }
 0x3c9   : > { %v896_v51 = vpop.f32.mrf.mxu1 }
 0x3cb   : > { %v1844_v52 = vpop.f32.mrf.mxu1 }
 0x437   : > { %v1009_v54 = vpop.f32.mrf.mxu1 }
 0x438   : > { %v1744_v56 = vpack.c.bf16 %v1009_v54, %v1009_v54 }
 0x439   : > { %v1855_v57 = vpop.f32.mrf.mxu1 }
 0x43a   : > { %1019 = vrot.lane.b32.xlu1 %v1744_v56, %s2089_s20 }
 0x43b   : > { %v1012_v58 = vpop.f32.mrf.mxu1 }
 0x43d   : > { %v1856_v59 = vpop.f32.mrf.mxu1 }
 0x43e   : > { %v1729_v59 = vld [vmem:[%s2521_s14] ss:$0 sm:$0xff] }
 0x43f   : > { %v1128_v61 = vpop.f32.mrf.mxu1 }
 0x440   : > { %v1745_v63 = vpack.c.bf16 %v1128_v61, %v1128_v61 }
 0x441   : > { %v1867_v0 = vpop.f32.mrf.mxu1 }
 0x442   : > { %1138 = vrot.lane.b32.xlu0 %v1745_v63, %s2090_s21  ;;  %s1621_s21 = sshll.u32 %s539_s30, 4  ;;  %s1622_s21 = int_to_ptr.vmem [resolvable:$true] %s1621_s21 }
 0x443   : > { %v1131_v2 = vpop.f32.mrf.mxu1  ;;  %s2022_s20 = scalar_lea.vmem %s1622_s21, 128  ;;  %p2029_p0 = scmp.lt.s32.totalorder %s1622_s21, %s2027_s28 }
 0x444   : > { %p2023_p11 = scmp.ne.s32.totalorder %s1622_s21, %s2022_s20  ;;  %p2030_p1 = scmp.lt.s32.totalorder %s2028_s27, %s2022_s20 }
 0x445   : > { %v1868_v3 = vpop.f32.mrf.mxu1 }
 0x446   : > { %p2024_p12 = pnand %p2023_p11, %p2221_p5  ;;  %p2031_p2 = por %p2030_p1, %p2029_p0 }
 0x447   : > { %v1247_v4 = vpop.f32.mrf.mxu1 }
 0x448   : > { %v1746_v6 = vpack.c.bf16 %v1247_v4, %v1247_v4  ;;  %p2025_p13 = pneg %p2024_p12 }
 0x449   : > { %v1879_v7 = vpop.f32.mrf.mxu1 }
 0x44a   : > { %1257 = vrot.lane.b32.xlu1 %v1746_v6, %s2091_s26  ;;  %p2032_p3 = pnand %p2031_p2, %p2025_p13 }
 0x44b   : > { %v1250_v8 = vpop.f32.mrf.mxu1 }
 0x44d   : > { %v1880_v9 = vpop.f32.mrf.mxu1 }
 0x4ac   : > { %v1020_v10 = vpop.permute.xlu1 %1019 }
 0x4ad   : > { %1023 = vst.msk [vmem:[#allocation2] sm:$0xf] %vm1022_vm6, %v1020_v10 }
 0x4b4   : > { %v1139_v11 = vpop.permute.xlu0 %1138 }
 0x4b5   : > { %1142 = vst.msk [vmem:[#allocation2] sm:$0xf] %vm1141_vm7, %v1139_v11 }
 0x4bc   : > { %v1258_v12 = vpop.permute.xlu1 %1257 }
 0x4bd   : > { %1261 = vst.msk [vmem:[#allocation2] sm:$0xf] %vm1260_vm8, %v1258_v12 }
 0x4c4   : > { %v1262_v13 = vld [vmem:[#allocation2] sm:$0xf] }
 0x4c5   : > { %1890 = vmatmul.mubr.msk.bf16.vlgmr.msra.gmra.mxu0 %vm586_vm1, %v1262_v13  ;;  %v1738_v13 = vld [vmem:[%s2522_s15] ss:$0 sm:$0xff] }
 0x4c6   : > { %1921 = vmatprep.mubr.msk.bf16.mxu0 %vm2085_vm0, %v2084_v1  ;;  %1906 = vmatpush3.bf16.msra.mxu0 %v1992_v30 }
 0x4c7   : > { %1907 = vmatprep.subr.bf16.mxu0 %v2084_v1 }
 0x4ca   : > { %1908 = vmatpush3.bf16.msra.mxu0 %v1993_v31 }
 0x4cb   : > { %1909 = vmatprep.subr.bf16.mxu0 %v2084_v1 }
 0x4ce   : > { %1910 = vmatpush3.bf16.msra.mxu0 %v1994_v43 }
 0x4cf   : > { %1911 = vmatprep.subr.bf16.mxu0 %v2084_v1 }
 0x4d2   : > { %1912 = vmatpush3.bf16.msra.mxu0 %v1995_v44 }
 0x4d3   : > { %1913 = vmatprep.subr.bf16.mxu0 %v2084_v1 }
 0x585   : > { %v1339_v15 = vpop.f32.mrf.mxu0 }
 0x586   : > { %v1340_v16 = vadd.f32 %v1715_v14, %v1339_v15  ;;  %v1739_v15 = vld [vmem:[%s2523_s16] ss:$0 sm:$0xff] }
 0x587   : > { %v1891_v17 = vpop.f32.mrf.mxu0 }
 0x588   : > { %v1347_v18 = vsel %vm586_vm1, %v1340_v16, 0.0 }
 0x589   : > { %1348 = vadd.xlane.f32.xlu0 %v1347_v18  ;;  %v1342_v19 = vpop.f32.mrf.mxu0 }
 0x58b   : > { %v1892_v20 = vpop.f32.mrf.mxu0 }
 0x612   : > { %v1349_v21 = vpop.xlane.xlu0 %1348 }
 0x613   : > { %v1351_v22 = vmul.f32 0.015625, %v1349_v21 }
 0x615   : > { %v1352_v23 = vsub.f32 %v1340_v16, %v1351_v22 }
 0x617   : > { %v1353_v24 = vmul.f32 %v1352_v23, %v1352_v23 }
 0x619   : > { %v1354_v25 = vsel %vm586_vm1, %v1353_v24, 0.0 }
 0x61a   : > { %1355 = vadd.xlane.f32.xlu1 %v1354_v25 }
 0x6a3   : > { %v1356_v32 = vpop.xlane.xlu1 %1355 }
 0x6a4   : > { %v1357_v33 = vmul.f32 0.015625, %v1356_v32 }
 0x6a6   : > { %v1358_v34 = vadd.f32 1e-05, %v1357_v33 }
 0x6a8   : > { %2016 = vrsqrt.f32 %v1358_v34 }
 0x6b5   : > { %v2017_v36 = vpop.eup %2016 }
 0x6b6   : > { %v1360_v37 = vmul.f32 %v2017_v36, %v1352_v23 }
 0x6b8   : > { %v1367_v39 = vmul.f32 %v1721_v35, %v1360_v37 }
 0x6ba   : > { %v1374_v40 = vadd.f32 %v1722_v38, %v1367_v39 }
 0x6bc   : > { %v2429_v41 = vadd.f32 %v1374_v40, %v2256_v5  ;;  %v1996_v5 = vld [vmem:[%s2520_s13 + $0x18] sm:$0xff]  }
 0x6bd   : > { %1914 = vmatpush3.bf16.msra.mxu0 %v1996_v5 }
 0x6be   : > { %v1376_v42 = vpack.c.bf16 %v2429_v41, %v2429_v41  ;;  %1915 = vmatprep.subr.bf16.mxu0 %v2084_v1 }
 0x6c0   : > { %1902 = vmatmul.mubr.msk.bf16.vlgmr.msra.gmra.mxu1 %vm586_vm1, %v1376_v42 }
 0x6c1   : > { %1916 = vmatpush3.bf16.msra.mxu0 %v1997_v45 }
 0x6c2   : > { %1917 = vmatprep.subr.bf16.mxu0 %v2084_v1 }
 0x6c5   : > { %1918 = vmatpush3.bf16.msra.mxu0 %v1998_v46 }
 0x6c6   : > { %1919 = vmatprep.subr.bf16.mxu0 %v2084_v1 }
 0x6c9   : > { %1920 = vmatpush3.bf16.msra.mxu0 %v1999_v47 }
 0x780   : > { %v1453_v49 = vpop.f32.mrf.mxu1 }
 0x781   : > { %v1454_v50 = vadd.f32 %v1723_v48, %v1453_v49 }
 0x782   : > { %v1903_v51 = vpop.f32.mrf.mxu1 }
 0x783   : > { %v1460_v52 = vmul.f32 0.70710677, %v1454_v50  ;;  %v1459_v56 = vmul.f32 0.5, %v1454_v50 }
 0x784   : > { %v1456_v53 = vpop.f32.mrf.mxu1 }
 0x785   : > { %2018 = verf.f32 %v1460_v52 }
 0x786   : > { %v1904_v54 = vpop.f32.mrf.mxu1 }
 0x792   : > { %v2019_v55 = vpop.eup %2018 }
 0x793   : > { %v1462_v57 = vadd.f32 1.0, %v2019_v55 }
 0x795   : > { %v1463_v1 = vmul.f32 %v1462_v57, %v1459_v56 }
 0x797   : > { %v1464_v58 = vpack.c.bf16 %v1463_v1, %v1463_v1 }
 0x799   : > { %1922 = vmatmul.mubr.bf16.vlgmr.msra.gmra.mxu0 %v1464_v58 }
 0x859   : > { %v1570_v60 = vpop.f32.mrf.mxu0 }
 0x85a   : > { %v1571_v61 = vadd.f32 %v1729_v59, %v1570_v60 }
 0x85b   : > { %v1923_v62 = vpop.f32.mrf.mxu0 }
 0x85c   : > { %v1578_v63 = vsel %vm586_vm1, %v1571_v61, 0.0 }
 0x85d   : > { %1579 = vadd.xlane.f32.xlu0 %v1578_v63  ;;  %v1573_v0 = vpop.f32.mrf.mxu0 }
 0x85f   : > { %v1924_v2 = vpop.f32.mrf.mxu0 }
 0x8e6   : > { %v1580_v3 = vpop.xlane.xlu0 %1579 }
 0x8e7   : > { %v1581_v4 = vmul.f32 0.015625, %v1580_v3 }
 0x8e9   : > { %v1582_v6 = vsub.f32 %v1571_v61, %v1581_v4 }
 0x8eb   : > { %v1583_v7 = vmul.f32 %v1582_v6, %v1582_v6 }
 0x8ed   : > { %v1584_v8 = vsel %vm586_vm1, %v1583_v7, 0.0 }
 0x8ee   : > { %1585 = vadd.xlane.f32.xlu0 %v1584_v8 }
 0x977   : > { %v1586_v9 = vpop.xlane.xlu0 %1585 }
 0x978   : > { %v1587_v10 = vmul.f32 0.015625, %v1586_v9 }
 0x97a   : > { %v1588_v11 = vadd.f32 1e-05, %v1587_v10 }
 0x97c   : > { %2020 = vrsqrt.f32 %v1588_v11 }
 0x989   : > { %v2021_v12 = vpop.eup %2020 }
 0x98a   : > { %v1590_v14 = vmul.f32 %v2021_v12, %v1582_v6 }
 0x98c   : > { %v1597_v16 = vmul.f32 %v1738_v13, %v1590_v14 }
 0x98e   : > { %v1604_v17 = vadd.f32 %v1739_v15, %v1597_v16 }
 0x990   : > { %v1605_v18 = vadd.f32 %v1604_v17, %v2429_v41 }
 0x992   : > { %1606 = vst.msk [vmem:[%s539_s30] sm:$0xff] %vm586_vm1, %v1605_v18 }
 0x993   : > { %2035 = shalt.err (!%p2032_p3)
}
 0x994   : > { %s2036_s22 = scalar_lea.hbm %s1619_s2, 128  ;;  %s2040_s30 = scalar_lea.hbm %s2524_s17, 256 }
 0x995   : > { %p2037_p4 = scmp.ne.s32.totalorder %s1619_s2, %s2036_s22  ;;  %p2041_p9 = scmp.lt.s32.totalorder %s1619_s2, %s2524_s17 }
 0x996   : > { %p2042_p10 = scmp.lt.s32.totalorder %s2040_s30, %s2036_s22 }
 0x997   : > { %p2038_p7 = pnand %p2037_p4, %p2221_p5 }
 0x998   : > { %p2043_p11 = por %p2042_p10, %p2041_p9 }
 0x999   : > { %p2039_p8 = pneg %p2038_p7 }
 0x99b   : > { %p2044_p12 = pnand %p2043_p11, %p2039_p8 }
 0x99d   : > { %2047 = shalt.err (!%p2044_p12)
}
 0x99e   : > { %1925 = dma.vmem_to_hbm [thread:$0]  (%p2221_p5), %s1622_s21, 128, %s1619_s2, %s1608_s0  }
 0x99f PF: > { %s2546_s20 = sld [smem:[#allocation8_spill]] }
 0x9a0   : > { %s2547_s18 = sld [smem:[#allocation6_spill]] }
 0x9a5   : > { %p1931_p13 = scmp.ge.s32.totalorder %s2546_s20, 2 }
 0x9a6   : > { %s1633_s27 = sand.u32 1, %s2547_s18  }
 0x9a7   : > { %p1928_p0 = pnand %p1931_p13, %p2225_p6  ;;  %s1634_s24 = scalar_lea.sflag [#allocation4], %s1633_s27 }
 0x9a9   : > { %p1929_p1 = pneg %p1928_p0 }
 0x9ab   : > { %2065 = dma.done.wait (%p1929_p1), %s1634_s24, 128  }
 0x9ac   : > { %2067 = vsyncadd (%p1929_p1), %s1634_s24, 4294967168  ;;  %s2549_s27 = sld [smem:[#allocation9_spill]]  ;;  %s2552_s24 = smov %s2074_s25 }
 0x9ad   : > { %s2550_s22 = sld [smem:[#allocation7_spill]] }
 0x9ae   : > { %s2551_s26 = sld [smem:[#allocation10_spill]] }
 0x9b2   : > { %p27_p2 = scmp.ge.s32.totalorder %s2549_s27, 4  }
 0x9b3   : > { %s2553_s25 = smov %s2550_s22 }
 0x9b4   :  { %29 = sbr.rel (!%p27_p2) target bundleno = 7 (0x7), region = 123 }
 0x9b9   :  { %1639 = vsyncpa [#allocation4], 1 }
 0x9ba   :  { %1641 = vsyncpa [#allocation4 + $0x1], 1 }

// kernel: transformer_forward.2
= control target key start
LH: loop header
LB: loop body
LE: loop exit
PB: predicated region body
PF: predicated region fallthrough
CT: control target
= control target key end

     0   :  { %s2900_s0 = inlined_call_operand.hbm [shape: f32[2,8,64], index: 0, kind: input, shape index: {}]   ;;  %s2901_s1 = inlined_call_operand.vmem [shape: bf16[64,64], index: 1, kind: input, shape index: {}]   ;;  %s2902_s2 = inlined_call_operand.vmem [shape: f32[1,64], index: 2, kind: input, shape index: {}]   ;;  %s2903_s3 = inlined_call_operand.vmem [shape: bf16[64,64], index: 3, kind: input, shape index: {}]   ;;  %s2904_s4 = inlined_call_operand.vmem [shape: f32[1,64], index: 4, kind: input, shape index: {}]   ;;  %s2905_s5 = inlined_call_operand.vmem [shape: bf16[64,64], index: 5, kind: input, shape index: {}]   ;;  %s2906_s6 = inlined_call_operand.vmem [shape: f32[1,64], index: 6, kind: input, shape index: {}]   ;;  %s2907_s7 = inlined_call_operand.hbm [shape: bf16[64,64], index: 7, kind: input, shape index: {}]   ;;  %s2908_s8 = inlined_call_operand.vmem [shape: f32[1,64], index: 8, kind: input, shape index: {}]   ;;  %s2909_s9 = inlined_call_operand.vmem [shape: f32[1,64], index: 9, kind: input, shape index: {}]   ;;  %s2910_s10 = inlined_call_operand.hbm [shape: f32[1,64], index: 10, kind: input, shape index: {}]   ;;  %s2911_s11 = inlined_call_operand.hbm [shape: bf16[64,128], index: 11, kind: input, shape index: {}]   ;;  %s2912_s12 = inlined_call_operand.hbm [shape: f32[1,128], index: 12, kind: input, shape index: {}]   ;;  %s2913_s13 = inlined_call_operand.vmem [shape: bf16[128,64], index: 13, kind: input, shape index: {}]   ;;  %s2914_s14 = inlined_call_operand.hbm [shape: f32[1,64], index: 14, kind: input, shape index: {}]   ;;  %s2915_s15 = inlined_call_operand.vmem [shape: f32[1,64], index: 15, kind: input, shape index: {}]   ;;  %s2916_s16 = inlined_call_operand.vmem [shape: f32[1,64], index: 16, kind: input, shape index: {}]   ;;  %s2917_s17 = inlined_call_operand.vmem [shape: f32[2,8,64], index: 17, kind: output, shape index: {}]  }
   0x1   :  { %2923 = sst [smem:[#allocation17_spill]] %s2900_s0 }
   0x2   :  { %2924 = sst [smem:[#allocation18_spill]] %s2901_s1 }
   0x3   :  { %2925 = sst [smem:[#allocation19_spill]] %s2907_s7 }
   0x4   :  { %2926 = sst [smem:[#allocation20_spill]] %s2910_s10 }
   0x5   :  { %2927 = sst [smem:[#allocation21_spill]] %s2911_s11 }
   0x6   :  { %2928 = sst [smem:[#allocation22_spill]] %s2912_s12 }
   0x7   :  { %2929 = sst [smem:[#allocation23_spill]] %s2915_s15 }
   0x8   :  { %2930 = sst [smem:[#allocation24_spill]] %s2916_s16 }
   0x9   :  { %2931 = sst [smem:[#allocation25_spill]] %s2917_s17 }
   0xa   :  { %22 = vsyncpa [#allocation4], 0 }
   0xb   :  { %24 = vsyncpa [#allocation4 + $0x1], 0 }
   0xc   :  { %25 = vsyncpa [#allocation6], 0 }
   0xd   :  { %26 = vsyncpa [#allocation9], 0 }
   0xe   :  { %27 = vsyncpa [#allocation12], 0  ;;  %s2524_s24 = smov 0   ;;  %s2526_s25 = smov 0  }
   0xf   :  { %s2528_s26 = smov 0   ;;  %s2530_s27 = smov 0  }
  0x10 LB: > { %s2418_s28 = smov [#allocation5]   ;;  %s2545_s0 = sadd.s32 4294967295, %s2416_s27   ;;  %s2416_s27 = sphi %s2530_s27, %s2958_s27   ;;  %s2412_s26 = sphi %s2528_s26, %s2957_s26   ;;  %s2408_s25 = sphi %s2526_s25, %s2956_s25   ;;  %s2404_s24 = sphi %s2524_s24, %s2955_s24  }
  0x11   : > { %s456_s29 = sshll.u32 %s2418_s28, 4  ;;  %p1808_p0 = scmp.ge.s32.totalorder %s2416_s27, 1  ;;  %s457_s29 = int_to_ptr.vmem [resolvable:$true] %s456_s29 }
  0x12   : > { %p2920_p1 = scmp.eq.s32.totalorder %s2545_s0, 0  ;;  %p426_p2 = scmp.lt.s32.totalorder %s2416_s27, 3 }
  0x13   : > { %s2419_s18 = smov [#allocation8]   ;;  %s2420_s20 = smov [#allocation7]  }
  0x14   : > { %p2550_p3 = pnand %p1808_p0, %p426_p2  ;;  %s486_s19 = sshll.u32 %s2419_s18, 4  ;;  %s2562_s19 = int_to_ptr.vmem [resolvable:$true] %s486_s19 }
  0x15   : > { %s476_s21 = sshll.u32 %s2420_s20, 4  ;;  %s2223_s23 = scalar_lea.vmem %s457_s29, 512  ;;  %s2564_s21 = int_to_ptr.vmem [resolvable:$true] %s476_s21 }
  0x16   : > { %s2932_s30 = scalar_select %p2550_p3, 1, 0 }
  0x17   : > { %p2084_p4 = pneg %p2550_p3  ;;  %p2224_p7 = scmp.ne.s32.totalorder %s457_s29, %s2223_s23 }
  0x18   : > { %p2231_p10 = scmp.lt.s32.totalorder %s457_s29, %s457_s29  ;;  %p2232_p11 = scmp.lt.s32.totalorder %s2223_s23, %s2223_s23 }
  0x19   : > { %p2558_p5 = pnand %p2084_p4, %p2920_p1 }
  0x1a   : > { %p2233_p12 = por %p2232_p11, %p2231_p10 }
  0x1b   : > { %p2568_p6 = pneg %p2558_p5 }
  0x1d   : > { %p2226_p8 = pnand %p2224_p7, %p2568_p6 }
  0x1f   : > { %p2227_p9 = pneg %p2226_p8 }
  0x21   : > { %p2234_p13 = pnand %p2233_p12, %p2227_p9 }
  0x23   : > { %2237 = shalt.err (!%p2234_p13)
}
  0x24   : > { %s2421_s28 = smov 64   ;;  %s2422_s18 = smov 4  }
  0x25   : > { %s2935_s7 = sld [smem:[#allocation19_spill]]  ;;  %s2249_s16 = scalar_lea.vmem %s2562_s19, 512 }
  0x26   : > { %p2250_p0 = scmp.ne.s32.totalorder %s2562_s19, %s2249_s16  ;;  %p2257_p7 = scmp.lt.s32.totalorder %s2562_s19, %s2562_s19 }
  0x27   : > { %p2258_p8 = scmp.lt.s32.totalorder %s2249_s16, %s2249_s16 }
  0x28   : > { %p2252_p2 = pnand %p2250_p0, %p2568_p6 }
  0x29   : > { %p2259_p9 = por %p2258_p8, %p2257_p7 }
  0x2a   : > { %p2253_p4 = pneg %p2252_p2 }
  0x2b   : > { %2087 = dma.hbm_to_vmem [thread:$0]  (!%p2558_p5), %s2935_s7, 512, %s457_s29, [#allocation6], %s2421_s28, %s2421_s28, %s2422_s18  }
  0x2c   : > { %p2260_p10 = pnand %p2259_p9, %p2253_p4 }
  0x2e   : > { %2263 = shalt.err (!%p2260_p10)
}
  0x2f   : > { %s2936_s11 = sld [smem:[#allocation21_spill]]  ;;  %s2275_s17 = scalar_lea.vmem %s2564_s21, 16 }
  0x30   : > { %p2276_p11 = scmp.ne.s32.totalorder %s2564_s21, %s2275_s17  ;;  %s2282_s16 = scalar_lea.vmem %s2564_s21, 32 }
  0x31   : > { %p2283_p0 = scmp.lt.s32.totalorder %s2564_s21, %s2564_s21  ;;  %p2284_p2 = scmp.lt.s32.totalorder %s2282_s16, %s2275_s17 }
  0x32   : > { %p2278_p12 = pnand %p2276_p11, %p2568_p6 }
  0x33   : > { %p2285_p4 = por %p2284_p2, %p2283_p0 }
  0x34   : > { %p2279_p13 = pneg %p2278_p12 }
  0x35   : > { %2093 = dma.hbm_to_vmem [thread:$0]  (!%p2558_p5), %s2936_s11, 512, %s2562_s19, [#allocation9], %s2421_s28, %s2421_s28, %s2422_s18  }
  0x36   : > { %p2286_p7 = pnand %p2285_p4, %p2279_p13 }
  0x38   : > { %2289 = shalt.err (!%p2286_p7)
}
  0x39   : > { %s2937_s10 = sld [smem:[#allocation20_spill]]  ;;  %s2423_s19 = smov [#allocation10]  }
  0x3a   : > { %s500_s28 = sshll.u32 %s2423_s19, 4  ;;  %s2424_s18 = smov [#allocation11]   ;;  %s501_s28 = int_to_ptr.vmem [resolvable:$true] %s500_s28 }
  0x3b   : > { %s514_s20 = sshll.u32 %s2424_s18, 4  ;;  %s2301_s23 = scalar_lea.vmem %s501_s28, 16  ;;  %s515_s20 = int_to_ptr.vmem [resolvable:$true] %s514_s20 }
  0x3c   : > { %p2302_p8 = scmp.ne.s32.totalorder %s501_s28, %s2301_s23  ;;  %s2308_s17 = scalar_lea.vmem %s501_s28, 32 }
  0x3d   : > { %p2309_p11 = scmp.lt.s32.totalorder %s501_s28, %s501_s28  ;;  %p2310_p12 = scmp.lt.s32.totalorder %s2308_s17, %s2301_s23 }
  0x3e   : > { %p2304_p9 = pnand %p2302_p8, %p2568_p6 }
  0x3f   : > { %2090 = dma.hbm_to_vmem [thread:$0]  (!%p2558_p5), %s2937_s10, 16, %s2564_s21, [#allocation6]  }
  0x40   : > { %p2305_p10 = pneg %p2304_p9  ;;  %p2311_p13 = por %p2310_p12, %p2309_p11 }
  0x42   : > { %p2312_p0 = pnand %p2311_p13, %p2305_p10 }
  0x44   : > { %2315 = shalt.err (!%p2312_p0)
}
  0x45   : > { %s2938_s12 = sld [smem:[#allocation22_spill]]  ;;  %s2327_s15 = scalar_lea.vmem %s515_s20, 16 }
  0x46   : > { %p2328_p2 = scmp.ne.s32.totalorder %s515_s20, %s2327_s15  ;;  %s2334_s29 = scalar_lea.vmem %s515_s20, 32 }
  0x47   : > { %p2335_p8 = scmp.lt.s32.totalorder %s515_s20, %s515_s20  ;;  %p2336_p9 = scmp.lt.s32.totalorder %s2334_s29, %s2327_s15 }
  0x48   : > { %p2330_p4 = pnand %p2328_p2, %p2568_p6 }
  0x49   : > { %p2337_p1 = por %p2336_p9, %p2335_p8 }
  0x4a   : > { %p2331_p7 = pneg %p2330_p4 }
  0x4b   : > { %2096 = dma.hbm_to_vmem [thread:$0]  (!%p2558_p5), %s2938_s12, 16, %s501_s28, [#allocation9]  }
  0x4c   : > { %p2338_p11 = pnand %p2337_p1, %p2331_p7 }
  0x4e   : > { %2341 = shalt.err (!%p2338_p11)
}
  0x4f   : > { %2099 = dma.hbm_to_vmem [thread:$0]  (!%p2558_p5), %s2914_s14, 16, %s515_s20, [#allocation12]  }
  0x50   : > { %s2619_s22 = sadd.s32 1, %s2416_s27   ;;  %s40_s28 = sadd.s32 1, %s2412_s26 }
  0x51   : > { %s37_s1 = ssub.s32 %s2416_s27, %s2619_s22  ;;  %p47_p6 = scmp.ne.s32.totalorder %s2412_s26, %s2408_s25 }
  0x52   : > { %p38_p1 = scmp.eq.s32.totalorder %s37_s1, 0  ;;  %p48_p10 = scmp.eq.s32.totalorder %s2416_s27, 0 }
  0x53   : > { %p53_p12 = scmp.ne.s32.totalorder %s2408_s25, %s2404_s24  ;;  %p2939_p0 = scmp.eq.s32.totalorder %s2545_s0, 0 }
  0x54   : > { %s2630_s23 = scalar_select %p38_p1, %s2412_s26, %s40_s28  }
  0x55   : > { %p49_p13 = por %p48_p10, %p47_p6  ;;  %p2634_p2 = por %p2939_p0, %p53_p12 }
  0x56   : > { %p2109_p4 = scmp.lt.s32.totalorder %s2416_s27, 2  ;;  %s531_s16 = sand.u32 1, %s2412_s26  }
  0x57   : > { %s2940_s17 = scalar_select %p2634_p2, 1, 0 }
  0x58   : > { %s1815_s20 = sshll.u32 %s531_s16, 3  ;;  %s1816_s21 = sshll.u32 %s2416_s27, 7 }
  0x59   : > { %s2941_s19 = sld [smem:[#allocation17_spill]]  ;;  %s535_s24 = scalar_lea.vmem [#allocation3], %s1815_s20 }
  0x5a   : > { %s542_s1 = sshll.u32 %s535_s24, 4  ;;  %p2646_p5 = pnand %p2109_p4, %p49_p13  ;;  %s543_s1 = int_to_ptr.vmem [resolvable:$true] %s542_s1 }
  0x5b   : > { %s532_s7 = scalar_lea.sflag [#allocation4], %s531_s16 }
  0x5c   : > { %p2344_p8 = pneg %p2646_p5 }
  0x5f   : > { %s2644_s18 = scalar_lea.hbm %s2941_s19, %s1816_s21  ;;  %s2347_s15 = scalar_lea.hbm %s2941_s19, 256 }
  0x60   : > { %s2342_s10 = scalar_lea.hbm %s2644_s18, 128  ;;  %p2348_p1 = scmp.lt.s32.totalorder %s2644_s18, %s2941_s19 }
  0x61   : > { %p2343_p7 = scmp.ne.s32.totalorder %s2644_s18, %s2342_s10  ;;  %p2349_p6 = scmp.lt.s32.totalorder %s2347_s15, %s2342_s10 }
  0x63   : > { %p2345_p9 = pnand %p2344_p8, %p2343_p7  ;;  %p2350_p10 = por %p2349_p6, %p2348_p1 }
  0x65   : > { %p2346_p11 = pneg %p2345_p9 }
  0x67   : > { %p2351_p12 = pnand %p2350_p10, %p2346_p11 }
  0x69   : > { %2354 = shalt.err (!%p2351_p12)
}
  0x6a   : > { %s2355_s24 = scalar_lea.vmem %s543_s1, 128  ;;  %s2425_s16 = smov [#allocation3]  }
  0x6b   : > { %p2356_p13 = scmp.ne.s32.totalorder %s543_s1, %s2355_s24  ;;  %s2360_s11 = sshll.u32 %s2425_s16, 4  ;;  %s2361_s11 = int_to_ptr.vmem [resolvable:$false] %s2360_s11 }
  0x6c   : > { %s2362_s12 = scalar_lea.vmem %s2361_s11, 256  ;;  %p2363_p7 = scmp.lt.s32.totalorder %s543_s1, %s2361_s11 }
  0x6d   : > { %p2358_p0 = pnand %p2356_p13, %p2344_p8  ;;  %p2364_p9 = scmp.lt.s32.totalorder %s2362_s12, %s2355_s24 }
  0x6f   : > { %p2359_p4 = pneg %p2358_p0  ;;  %p2365_p2 = por %p2364_p9, %p2363_p7 }
  0x71   : > { %p2366_p3 = pnand %p2365_p2, %p2359_p4 }
  0x73   : > { %2369 = shalt.err (!%p2366_p3)
}
  0x74   : > { %2103 = dma.hbm_to_vmem [thread:$0]  (!%p2646_p5), %s2644_s18, 128, %s543_s1, %s532_s7  }
  0x75   : > { %p2943_p11 = scmp.ne.s32.totalorder %s2932_s30, 0 }
  0x76   : > { %s553_s10 = sand.u32 (!%p2943_p11), 1, %s2408_s25   ;;  %p2944_p8 = scmp.ne.s32.totalorder (!%p2943_p11), %s2940_s17, 0 }
  0x77   : > { %551 = sbr.rel (%p2943_p11) target bundleno = 2564 (0xa04), region = 88  ;;  %s1818_s27 = sshll.u32 (!%p2943_p11), %s553_s10, 3 }
  0x78   : > { %s554_s21 = scalar_lea.sflag (!%p2943_p11), [#allocation4], %s553_s10  ;;  %s557_s15 = scalar_lea.vmem (!%p2943_p11), [#allocation3], %s1818_s27 }
  0x7c   : > { %2387 = dma.done.wait (%p2944_p8), %s554_s21, 128  }
  0x7d   : > { %2389 = vsyncadd (%p2944_p8), %s554_s21, 4294967168  ;;  %p2945_p3 = scmp.eq.s32.totalorder %s2545_s0, 0 }
  0x7f   : > { %2391 = dma.done.wait (%p2945_p3), [#allocation6], 528   ;;  %p2946_p2 = pmov %p2945_p3 }
  0x81   : > { %2393 = vsyncadd (%p2946_p2), [#allocation6], 4294966768  ;;  %p2947_p5 = pmov %p2946_p2 }
  0x82   : > { %p2948_p1 = pmov %p2946_p2 }
  0x83   : > { %2395 = dma.done.wait (%p2947_p5), [#allocation9], 528  }
  0x84   : > { %2397 = vsyncadd (%p2948_p1), [#allocation9], 4294966768  ;;  %p2949_p6 = pmov %p2948_p1 }
  0x85   : > { %p2950_p10 = pmov %p2948_p1 }
  0x86   : > { %2399 = dma.done.wait (%p2949_p6), [#allocation12], 16  }
  0x87   : > { %2401 = vsyncadd (%p2950_p10), [#allocation12], 4294967280  ;;  %v2426_v0 = vmov 0.0   ;;  %vm2427_vm0 = vmmov 0   ;;  %s2951_s12 = sld [smem:[#allocation18_spill]]  ;;  %v2703_v5 = vld [vmem:[%s557_s15] sm:$0xff] }
  0x88   : > { %1934 = vmatprep.subr.bf16.mxu1 %v2426_v0  ;;  %1942 = vmatprep.mubr.msk.bf16.mxu1 %vm2427_vm0, %v2426_v0  ;;  %vm673_vm1 = vcmask 523264   ;;  %v2166_v6 = vld [vmem:[%s2903_s3 + $0x18] sm:$0xff]   ;;  %v633_v7 = vpack.c.bf16 %v2703_v5, %v2703_v5  ;;  %v2167_v8 = vld [vmem:[%s2903_s3 + $0x10] sm:$0xff]   ;;  %v2168_v9 = vld [vmem:[%s2903_s3 + $0x8] sm:$0xff]   ;;  %vm879_vm2 = vcmask 130048   ;;  %s2428_s21 = smov 96  }
  0x89   : > { %1958 = vmatprep.subr.bf16.mxu0 %v2426_v0  ;;  %1966 = vmatprep.mubr.msk.bf16.mxu0 %vm2427_vm0, %v2426_v0  ;;  %v2169_v10 = vld [vmem:[%s2903_s3] sm:$0xff]   ;;  %v2170_v11 = vld [vmem:[%s2905_s5 + $0x18] sm:$0xff]   ;;  %v2171_v12 = vld [vmem:[%s2905_s5 + $0x10] sm:$0xff]   ;;  %s2429_s15 = smov 112   ;;  %s2430_s7 = smov 80   ;;  %vm942_vm3 = vcmask 1043456  }
  0x8a   : > { %1959 = vmatpush3.bf16.msra.mxu0 %v2170_v11  ;;  %v2172_v13 = vld [vmem:[%s2905_s5 + $0x8] sm:$0xff]   ;;  %v2173_v14 = vld [vmem:[%s2905_s5] sm:$0xff]   ;;  %vm926_vm4 = vcmask 64512   ;;  %vm987_vm5 = vcmask 125952   ;;  %s2431_s17 = smov 16   ;;  %s2432_s18 = smov 32  }
  0x8b   : > { %1960 = vmatprep.subr.bf16.mxu0 %v2426_v0  ;;  %v1825_v19 = vld [vmem:[%s2902_s2] ss:$0 sm:$0xff]  ;;  %s2433_s1 = smov 48   ;;  %vm1109_vm6 = vcmask 257152   ;;  %vm1228_vm7 = vcmask 388352   ;;  %vm1347_vm8 = vcmask 519552  }
  0x8c   : > { %v1831_v20 = vld [vmem:[%s2904_s4] ss:$0 sm:$0xff]  ;;  %p627_p12 = scmp.lt.s32.totalorder %s2545_s0, 1  ;;  %s2953_s11 = sld [smem:[#allocation24_spill]] }
  0x8d   : > { %v2162_v1 = vld [vmem:[%s2951_s12 + $0x18] sm:$0xff]   ;;  %v2163_v2 = vld [vmem:[%s2951_s12 + $0x10] sm:$0xff]   ;;  %v2164_v3 = vld [vmem:[%s2951_s12 + $0x8] sm:$0xff]  }
  0x8e   : > { %1935 = vmatpush3.bf16.msra.mxu1 %v2162_v1  ;;  %v2165_v4 = vld [vmem:[%s2951_s12] sm:$0xff]   ;;  %1961 = vmatpush3.bf16.msra.mxu0 %v2171_v12  ;;  %s2960_s0 = smov (!%p627_p12, %s2545_s0), 1 }
  0x8f   : > { %1936 = vmatprep.subr.bf16.mxu1 %v2426_v0  ;;  %1962 = vmatprep.subr.bf16.mxu0 %v2426_v0  ;;  %v1837_v31 = vld [vmem:[%s2906_s6] ss:$0 sm:$0xff]  ;;  %s1824_s30 = sshll.u32 %s2960_s0, 3 }
  0x92   : > { %1937 = vmatpush3.bf16.msra.mxu1 %v2163_v2  ;;  %1963 = vmatpush3.bf16.msra.mxu0 %v2172_v13 }
  0x93   : > { %1938 = vmatprep.subr.bf16.mxu1 %v2426_v0  ;;  %1964 = vmatprep.subr.bf16.mxu0 %v2426_v0 }
  0x96   : > { %1939 = vmatpush3.bf16.msra.mxu1 %v2164_v3  ;;  %1965 = vmatpush3.bf16.msra.mxu0 %v2173_v14 }
  0x97   : > { %1940 = vmatprep.subr.bf16.mxu1 %v2426_v0  ;;  %1982 = vmatprep.subr.bf16.mxu0 %v2426_v0 }
  0x99   : > { %1967 = vmatmul.mubr.msk.bf16.vlgmr.msra.gmra.mxu0 %vm673_vm1, %v633_v7 }
  0x9a   : > { %1941 = vmatpush3.bf16.msra.mxu1 %v2165_v4  ;;  %1984 = vmatprep.mubr.msk.bf16.mxu0 %vm2427_vm0, %v2426_v0 }
  0x9b   : > { %1946 = vmatprep.subr.bf16.mxu1 %v2426_v0 }
  0x9d   : > { %1943 = vmatmul.mubr.msk.bf16.vlgmr.msra.gmra.mxu1 %vm673_vm1, %v633_v7 }
  0x9e   : > { %1947 = vmatpush3.bf16.msra.mxu1 %v2166_v6  ;;  %1954 = vmatprep.mubr.msk.bf16.mxu1 %vm2427_vm0, %v2426_v0 }
  0x9f   : > { %1948 = vmatprep.subr.bf16.mxu1 %v2426_v0 }
  0xa2   : > { %1949 = vmatpush3.bf16.msra.mxu1 %v2167_v8 }
  0xa3   : > { %1950 = vmatprep.subr.bf16.mxu1 %v2426_v0 }
  0xa6   : > { %1951 = vmatpush3.bf16.msra.mxu1 %v2168_v9 }
  0xa7   : > { %1952 = vmatprep.subr.bf16.mxu1 %v2426_v0 }
  0xaa   : > { %1953 = vmatpush3.bf16.msra.mxu1 %v2169_v10 }
  0xab   : > { %1970 = vmatprep.subr.bf16.mxu1 %v2426_v0 }
  0xad   : > { %1955 = vmatmul.mubr.msk.bf16.vlgmr.msra.gmra.mxu1 %vm673_vm1, %v633_v7 }
  0xae   : > { %1972 = vmatprep.mubr.msk.bf16.mxu1 %vm2427_vm0, %v2426_v0 }
 0x159   : > { %v872_v32 = vpop.f32.mrf.mxu0 }
 0x15a   : > { %v873_v33 = vadd.f32 %v1837_v31, %v872_v32 }
 0x15b   : > { %v1968_v34 = vpop.f32.mrf.mxu0 }
 0x15c   : > { %v2770_v35 = vpack.c.bf16 %v873_v33, %v873_v33 }
 0x15d   : > { %v711_v15 = vpop.f32.mrf.mxu1  ;;  %v875_v36 = vpop.f32.mrf.mxu0 }
 0x15e   : > { %v712_v21 = vadd.f32 %v1825_v19, %v711_v15  ;;  %v944_v37 = vsel %vm942_vm3, %v2770_v35, 0 }
 0x15f   : > { %v1944_v16 = vpop.f32.mrf.mxu1  ;;  %v1969_v38 = vpop.f32.mrf.mxu0 }
 0x160   : > { %v717_v25 = vmul.f32 0.25, %v712_v21 }
 0x161   : > { %v714_v17 = vpop.f32.mrf.mxu1 }
 0x162   : > { %v718_v30 = vpack.c.bf16 %v717_v25, %v717_v25 }
 0x163   : > { %v1945_v18 = vpop.f32.mrf.mxu1 }
 0x16d   : > { %v792_v22 = vpop.f32.mrf.mxu1 }
 0x16e   : > { %v793_v23 = vadd.f32 %v1831_v20, %v792_v22 }
 0x16f   : > { %v1956_v24 = vpop.f32.mrf.mxu1 }
 0x170   : > { %v798_v26 = vpack.c.bf16 %v793_v23, %v793_v23 }
 0x171   : > { %v795_v27 = vpop.f32.mrf.mxu1 }
 0x172   : > { %1113 = vrot.lane.b32.xlu1 %v798_v26, %s2428_s21  ;;  %993 = vrot.lane.b32.xlu0 %v798_v26, %s2429_s15  ;;  %v884_v28 = vsel %vm879_vm2, %v798_v26, 0 }
 0x173   : > { %v1957_v29 = vpop.f32.mrf.mxu1  ;;  %1971 = vmatpush3.bf16.xpose.msra.mxu1 %v884_v28 }
 0x174   : > { %1976 = vmatprep.subr.bf16.mxu1 %v2426_v0 }
 0x176   : > { %1111 = vrot.lane.b32.xlu1 %v718_v30, %s2428_s21  ;;  %990 = vrot.lane.b32.xlu0 %v718_v30, %s2429_s15 }
 0x17a   : > { %1230 = vrot.lane.b32.xlu1 %v718_v30, %s2430_s7  ;;  %1232 = vrot.lane.b32.xlu0 %v798_v26, %s2430_s7 }
 0x17b   : > { %1973 = vmatmul.mubr.msk.bf16.vlgmr.msra.gmra.mxu1 %vm879_vm2, %v718_v30 }
 0x17c   : > { %1978 = vmatprep.mubr.msk.bf16.mxu1 %vm2427_vm0, %v2426_v0  ;;  %1977 = vmatpush3.bf16.msra.mxu1 %v944_v37 }
 0x17d   : > { %1988 = vmatprep.subr.bf16.mxu1 %v2426_v0 }
 0x1e4   : > { %v994_v39 = vpop.permute.xlu0 %993  ;;  %v1114_v41 = vpop.permute.xlu1 %1113 }
 0x1e5   : > { %v999_v40 = vsel %vm879_vm2, %v994_v39, 0  ;;  %v1119_v43 = vsel %vm879_vm2, %v1114_v41, 0 }
 0x1e6   : > { %1983 = vmatpush3.bf16.xpose.msra.mxu0 %v999_v40 }
 0x1e7   : > { %1994 = vmatprep.subr.bf16.mxu0 %v2426_v0 }
 0x1e8   : > { %v991_v42 = vpop.permute.xlu0 %990  ;;  %v1112_v45 = vpop.permute.xlu1 %1111 }
 0x1ec   : > { %v1233_v44 = vpop.permute.xlu0 %1232  ;;  %v1231_v47 = vpop.permute.xlu1 %1230 }
 0x1ed   : > { %1985 = vmatmul.mubr.msk.bf16.vlgmr.msra.gmra.mxu0 %vm879_vm2, %v991_v42  ;;  %v1238_v46 = vsel %vm879_vm2, %v1233_v44, 0 }
 0x1ee   : > { %1995 = vmatpush3.bf16.xpose.msra.mxu0 %v1119_v43  ;;  %1996 = vmatprep.mubr.msk.bf16.mxu0 %vm2427_vm0, %v2426_v0 }
 0x1ef   : > { %2006 = vmatprep.subr.bf16.mxu0 %v2426_v0 }
 0x1f5   : > { %1997 = vmatmul.mubr.msk.bf16.vlgmr.msra.gmra.mxu0 %vm879_vm2, %v1112_v45 }
 0x1f6   : > { %2007 = vmatpush3.bf16.xpose.msra.mxu0 %v1238_v46  ;;  %2008 = vmatprep.mubr.msk.bf16.mxu0 %vm2427_vm0, %v2426_v0 }
 0x1f7   : > { %2018 = vmatprep.subr.bf16.mxu0 %v2426_v0 }
 0x1fd   : > { %2009 = vmatmul.mubr.msk.bf16.vlgmr.msra.gmra.mxu0 %vm879_vm2, %v1231_v47 }
 0x1fe   : > { %2026 = vmatprep.mubr.msk.bf16.mxu0 %vm2427_vm0, %v2426_v0 }
 0x23b   : > { %v920_v48 = vpop.f32.mrf.mxu1 }
 0x23c   : > { %v927_v49 = vsel %vm926_vm4, %v920_v48, -inf }
 0x23d   : > { %928 = vmax.xlane.f32.xlu0 %v927_v49  ;;  %v1974_v50 = vpop.f32.mrf.mxu1 }
 0x23f   : > { %v923_v51 = vpop.f32.mrf.mxu1 }
 0x241   : > { %v1975_v52 = vpop.f32.mrf.mxu1 }
 0x2ad   : > { %v1035_v53 = vpop.f32.mrf.mxu0 }
 0x2ae   : > { %v1041_v54 = vsel %vm926_vm4, %v1035_v53, -inf }
 0x2af   : > { %1042 = vmax.xlane.f32.xlu1 %v1041_v54  ;;  %v1986_v55 = vpop.f32.mrf.mxu0 }
 0x2b0   : > { %v2175_v55 = vld [vmem:[#allocation5 + $0x10] sm:$0xff]  }
 0x2b1   : > { %v1038_v56 = vpop.f32.mrf.mxu0 }
 0x2b3   : > { %v1987_v57 = vpop.f32.mrf.mxu0 }
 0x2b5   : > { %v1155_v58 = vpop.f32.mrf.mxu0 }
 0x2b6   : > { %v1161_v59 = vsel %vm926_vm4, %v1155_v58, -inf }
 0x2b7   : > { %v1998_v60 = vpop.f32.mrf.mxu0  ;;  %1162 = vmax.xlane.f32.xlu0 %v1161_v59 }
 0x2b8   : > { %v2176_v60 = vld [vmem:[#allocation5 + $0x8] sm:$0xff]  }
 0x2b9   : > { %v1158_v61 = vpop.f32.mrf.mxu0 }
 0x2bb   : > { %v1999_v62 = vpop.f32.mrf.mxu0 }
 0x2bc   : > { %v2177_v62 = vld [vmem:[#allocation5] sm:$0xff]  }
 0x2bd   : > { %v1274_v63 = vpop.f32.mrf.mxu0 }
 0x2be   : > { %v1280_v1 = vsel %vm926_vm4, %v1274_v63, -inf }
 0x2bf   : > { %v2010_v2 = vpop.f32.mrf.mxu0  ;;  %1281 = vmax.xlane.f32.xlu0 %v1280_v1 }
 0x2c1   : > { %v1277_v3 = vpop.f32.mrf.mxu0 }
 0x2c3   : > { %v2011_v4 = vpop.f32.mrf.mxu0 }
 0x2c6   : > { %v929_v6 = vpop.xlane.xlu0 %928 }
 0x2c7   : > { %v930_v7 = vsub.f32 %v920_v48, %v929_v6 }
 0x2c9   : > { %v931_v8 = vmul.f32 1.442695, %v930_v7 }
 0x2cb   : > { %2190 = vpow2.f32 %v931_v8 }
 0x2d8   : > { %v2191_v9 = vpop.eup %2190 }
 0x2d9   : > { %v933_v10 = vsel %vm926_vm4, %v2191_v9, 0.0 }
 0x2da   : > { %934 = vadd.xlane.f32.xlu1 %v933_v10 }
 0x2eb   : > { %1054 = vrot.lane.b32.xlu1 %v2770_v35, %s2429_s15 }
 0x338   : > { %v1043_v11 = vpop.xlane.xlu1 %1042 }
 0x339   : > { %v1044_v12 = vsub.f32 %v1035_v53, %v1043_v11  ;;  %v2174_v53 = vld [vmem:[#allocation5 + $0x18] sm:$0xff]  }
 0x33a   : > { %2019 = vmatpush3.bf16.msra.mxu0 %v2174_v53 }
 0x33b   : > { %v1045_v13 = vmul.f32 1.442695, %v1044_v12  ;;  %2020 = vmatprep.subr.bf16.mxu0 %v2426_v0 }
 0x33d   : > { %2192 = vpow2.f32 %v1045_v13 }
 0x33e   : > { %2021 = vmatpush3.bf16.msra.mxu0 %v2175_v55 }
 0x33f   : > { %2022 = vmatprep.subr.bf16.mxu0 %v2426_v0 }
 0x340   : > { %v1163_v14 = vpop.xlane.xlu0 %1162 }
 0x341   : > { %v1164_v15 = vsub.f32 %v1155_v58, %v1163_v14  ;;  %v1854_v14 = vld [vmem:[%s2908_s8] ss:$0 sm:$0xff] }
 0x342   : > { %2023 = vmatpush3.bf16.msra.mxu0 %v2176_v60 }
 0x343   : > { %v1165_v16 = vmul.f32 1.442695, %v1164_v15  ;;  %2024 = vmatprep.subr.bf16.mxu0 %v2426_v0 }
 0x345   : > { %2194 = vpow2.f32 %v1165_v16 }
 0x346   : > { %2025 = vmatpush3.bf16.msra.mxu0 %v2177_v62 }
 0x347   : > { %2042 = vmatprep.subr.bf16.mxu0 %v2426_v0 }
 0x348   : > { %v1282_v17 = vpop.xlane.xlu0 %1281 }
 0x349   : > { %v1283_v18 = vsub.f32 %v1274_v63, %v1282_v17 }
 0x34a   : > { %v2193_v19 = vpop.eup %2192 }
 0x34b   : > { %v1284_v20 = vmul.f32 1.442695, %v1283_v18  ;;  %v1047_v21 = vsel %vm926_vm4, %v2193_v19, 0.0 }
 0x34c   : > { %1048 = vadd.xlane.f32.xlu0 %v1047_v21 }
 0x34d   : > { %2196 = vpow2.f32 %v1284_v20 }
 0x352   : > { %v2195_v22 = vpop.eup %2194 }
 0x353   : > { %v1167_v23 = vsel %vm926_vm4, %v2195_v22, 0.0 }
 0x354   : > { %1168 = vadd.xlane.f32.xlu1 %v1167_v23 }
 0x35a   : > { %v2197_v24 = vpop.eup %2196 }
 0x35b   : > { %v1286_v25 = vsel %vm926_vm4, %v2197_v24, 0.0 }
 0x35c   : > { %1287 = vadd.xlane.f32.xlu0 %v1286_v25 }
 0x363   : > { %v935_v26 = vpop.xlane.xlu1 %934 }
 0x364   : > { %2198 = vrcp.f32 %v935_v26  ;;  %v2178_v26 = vld [vmem:[#allocation8 + $0x18] sm:$0xff]  }
 0x365   : > { %1292 = vrot.lane.b32.xlu1 %v2770_v35, %s2430_s7 }
 0x367   : > { %v1055_v29 = vpop.permute.xlu1 %1054 }
 0x368   : > { %v1060_v31 = vsel %vm942_vm3, %v1055_v29, 0  ;;  %v2181_v29 = vld [vmem:[#allocation8] sm:$0xff]  }
 0x371   : > { %v2199_v27 = vpop.eup %2198 }
 0x372   : > { %1173 = vrot.lane.b32.xlu0 %v2770_v35, %s2428_s21  ;;  %v937_v28 = vmul.f32 %v2199_v27, %v2191_v9  ;;  %v2179_v27 = vld [vmem:[#allocation8 + $0x10] sm:$0xff]   ;;  %s2952_s21 = sld [smem:[#allocation23_spill]] }
 0x374   : > { %v938_v30 = vpack.c.bf16 %v937_v28, %v937_v28  ;;  %v2180_v28 = vld [vmem:[#allocation8 + $0x8] sm:$0xff]  }
 0x376   : > { %1979 = vmatmul.mubr.msk.bf16.vlgmr.msra.gmra.mxu1 %vm926_vm4, %v938_v30  ;;  %v2182_v30 = vld [vmem:[%s2913_s13 + $0x38] sm:$0xff]  }
 0x377   : > { %1989 = vmatpush3.bf16.msra.mxu1 %v1060_v31  ;;  %1990 = vmatprep.mubr.msk.bf16.mxu1 %vm2427_vm0, %v2426_v0  ;;  %v2183_v31 = vld [vmem:[%s2913_s13 + $0x30] sm:$0xff]  }
 0x378   : > { %2000 = vmatprep.subr.bf16.mxu1 %v2426_v0 }
 0x3d5   : > { %v1049_v32 = vpop.xlane.xlu0 %1048 }
 0x3d6   : > { %2200 = vrcp.f32 %v1049_v32 }
 0x3dd   : > { %v1169_v33 = vpop.xlane.xlu1 %1168 }
 0x3de   : > { %2202 = vrcp.f32 %v1169_v33 }
 0x3e1   : > { %v1293_v42 = vpop.permute.xlu1 %1292 }
 0x3e2   : > { %v1298_v44 = vsel %vm942_vm3, %v1293_v42, 0 }
 0x3e3   : > { %v2201_v34 = vpop.eup %2200 }
 0x3e4   : > { %v1051_v36 = vmul.f32 %v2201_v34, %v2193_v19 }
 0x3e5   : > { %v1288_v35 = vpop.xlane.xlu0 %1287 }
 0x3e6   : > { %2204 = vrcp.f32 %v1288_v35  ;;  %v1052_v37 = vpack.c.bf16 %v1051_v36, %v1051_v36  ;;  %v1860_v35 = vld [vmem:[%s2909_s9] ss:$0 sm:$0xff] }
 0x3e8   : > { %1991 = vmatmul.mubr.msk.bf16.vlgmr.msra.gmra.mxu1 %vm926_vm4, %v1052_v37 }
 0x3e9   : > { %v1174_v38 = vpop.permute.xlu0 %1173  ;;  %2002 = vmatprep.mubr.msk.bf16.mxu1 %vm2427_vm0, %v2426_v0 }
 0x3ea   : > { %v1179_v39 = vsel %vm942_vm3, %v1174_v38, 0  ;;  %v1861_v38 = vld [vmem:[#allocation7] ss:$0 sm:$0xff] }
 0x3eb   : > { %v2203_v40 = vpop.eup %2202  ;;  %2001 = vmatpush3.bf16.msra.mxu1 %v1179_v39 }
 0x3ec   : > { %2012 = vmatprep.subr.bf16.mxu1 %v2426_v0  ;;  %v1171_v41 = vmul.f32 %v2203_v40, %v2195_v22 }
 0x3ee   : > { %v1172_v43 = vpack.c.bf16 %v1171_v41, %v1171_v41 }
 0x3f0   : > { %2003 = vmatmul.mubr.msk.bf16.vlgmr.msra.gmra.mxu1 %vm926_vm4, %v1172_v43  ;;  %v2184_v43 = vld [vmem:[%s2913_s13 + $0x28] sm:$0xff]  }
 0x3f1   : > { %2013 = vmatpush3.bf16.msra.mxu1 %v1298_v44  ;;  %2014 = vmatprep.mubr.msk.bf16.mxu1 %vm2427_vm0, %v2426_v0  ;;  %v2185_v44 = vld [vmem:[%s2913_s13 + $0x20] sm:$0xff]  }
 0x3f2   : > { %2030 = vmatprep.subr.bf16.mxu1 %v2426_v0 }
 0x3f3   : > { %v2205_v45 = vpop.eup %2204 }
 0x3f4   : > { %v1290_v46 = vmul.f32 %v2205_v45, %v2197_v24  ;;  %v2187_v45 = vld [vmem:[%s2913_s13 + $0x10] sm:$0xff]  }
 0x3f6   : > { %v1291_v47 = vpack.c.bf16 %v1290_v46, %v1290_v46  ;;  %v2188_v46 = vld [vmem:[%s2913_s13 + $0x8] sm:$0xff]  }
 0x3f8   : > { %2015 = vmatmul.mubr.msk.bf16.vlgmr.msra.gmra.mxu1 %vm926_vm4, %v1291_v47  ;;  %v2189_v47 = vld [vmem:[%s2913_s13] sm:$0xff]  }
 0x3f9   : > { %2038 = vmatprep.mubr.msk.bf16.mxu1 %vm2427_vm0, %v2426_v0  ;;  %2031 = vmatpush3.bf16.msra.mxu1 %v2178_v26 }
 0x3fa   : > { %2032 = vmatprep.subr.bf16.mxu1 %v2426_v0 }
 0x3fd   : > { %2033 = vmatpush3.bf16.msra.mxu1 %v2179_v27 }
 0x3fe   : > { %2034 = vmatprep.subr.bf16.mxu1 %v2426_v0 }
 0x401   : > { %2035 = vmatpush3.bf16.msra.mxu1 %v2180_v28 }
 0x402   : > { %2036 = vmatprep.subr.bf16.mxu1 %v2426_v0 }
 0x405   : > { %2037 = vmatpush3.bf16.msra.mxu1 %v2181_v29 }
 0x436   : > { %v980_v48 = vpop.f32.mrf.mxu1 }
 0x437   : > { %v986_v49 = vpack.c.bf16 %v980_v48, %v980_v48  ;;  %v1862_v48 = vld [vmem:[#allocation10] ss:$0 sm:$0xff] }
 0x438   : > { %v1980_v50 = vpop.f32.mrf.mxu1 }
 0x439   : > { %988 = vst.msk [vmem:[#allocation2] sm:$0xf] %vm987_vm5, %v986_v49 }
 0x43a   : > { %v983_v51 = vpop.f32.mrf.mxu1 }
 0x43c   : > { %v1981_v52 = vpop.f32.mrf.mxu1 }
 0x4a8   : > { %v1096_v54 = vpop.f32.mrf.mxu1 }
 0x4a9   : > { %v1881_v56 = vpack.c.bf16 %v1096_v54, %v1096_v54 }
 0x4aa   : > { %v1992_v57 = vpop.f32.mrf.mxu1 }
 0x4ab   : > { %1106 = vrot.lane.b32.xlu1 %v1881_v56, %s2431_s17 }
 0x4ac   : > { %v1099_v58 = vpop.f32.mrf.mxu1 }
 0x4ae   : > { %v1993_v59 = vpop.f32.mrf.mxu1 }
 0x4b0   : > { %v1215_v61 = vpop.f32.mrf.mxu1 }
 0x4b1   : > { %v1882_v63 = vpack.c.bf16 %v1215_v61, %v1215_v61 }
 0x4b2   : > { %v2004_v1 = vpop.f32.mrf.mxu1 }
 0x4b3   : > { %1225 = vrot.lane.b32.xlu0 %v1882_v63, %s2432_s18 }
 0x4b4   : > { %v1218_v2 = vpop.f32.mrf.mxu1 }
 0x4b6   : > { %v2005_v3 = vpop.f32.mrf.mxu1 }
 0x4b8   : > { %v1334_v4 = vpop.f32.mrf.mxu1 }
 0x4b9   : > { %v1883_v6 = vpack.c.bf16 %v1334_v4, %v1334_v4 }
 0x4ba   : > { %v2016_v7 = vpop.f32.mrf.mxu1 }
 0x4bb   : > { %1344 = vrot.lane.b32.xlu1 %v1883_v6, %s2433_s1  ;;  %s2954_s1 = sld [smem:[#allocation25_spill]] }
 0x4bc   : > { %v1337_v8 = vpop.f32.mrf.mxu1 }
 0x4be   : > { %v2017_v9 = vpop.f32.mrf.mxu1 }
 0x4c1   : > { %s630_s28 = scalar_lea.vmem %s2954_s1, %s1824_s30 }
 0x51d   : > { %v1107_v10 = vpop.permute.xlu1 %1106 }
 0x51e   : > { %1110 = vst.msk [vmem:[#allocation2] sm:$0xf] %vm1109_vm6, %v1107_v10 }
 0x525   : > { %v1226_v11 = vpop.permute.xlu0 %1225 }
 0x526   : > { %1229 = vst.msk [vmem:[#allocation2] sm:$0xf] %vm1228_vm7, %v1226_v11 }
 0x52d   : > { %v1345_v12 = vpop.permute.xlu1 %1344 }
 0x52e   : > { %1348 = vst.msk [vmem:[#allocation2] sm:$0xf] %vm1347_vm8, %v1345_v12 }
 0x535   : > { %v1349_v13 = vld [vmem:[#allocation2] sm:$0xf] }
 0x536   : > { %2027 = vmatmul.mubr.msk.bf16.vlgmr.msra.gmra.mxu0 %vm673_vm1, %v1349_v13  ;;  %v1877_v13 = vld [vmem:[%s2952_s21] ss:$0 sm:$0xff] }
 0x537   : > { %2058 = vmatprep.mubr.msk.bf16.mxu0 %vm2427_vm0, %v2426_v0  ;;  %2043 = vmatpush3.bf16.msra.mxu0 %v2182_v30 }
 0x538   : > { %2044 = vmatprep.subr.bf16.mxu0 %v2426_v0 }
 0x53b   : > { %2045 = vmatpush3.bf16.msra.mxu0 %v2183_v31 }
 0x53c   : > { %2046 = vmatprep.subr.bf16.mxu0 %v2426_v0 }
 0x53f   : > { %2047 = vmatpush3.bf16.msra.mxu0 %v2184_v43 }
 0x540   : > { %2048 = vmatprep.subr.bf16.mxu0 %v2426_v0 }
 0x543   : > { %2049 = vmatpush3.bf16.msra.mxu0 %v2185_v44 }
 0x544   : > { %2050 = vmatprep.subr.bf16.mxu0 %v2426_v0 }
 0x5f6   : > { %v1426_v15 = vpop.f32.mrf.mxu0 }
 0x5f7   : > { %v1427_v16 = vadd.f32 %v1854_v14, %v1426_v15  ;;  %v1878_v15 = vld [vmem:[%s2953_s11] ss:$0 sm:$0xff] }
 0x5f8   : > { %v2028_v17 = vpop.f32.mrf.mxu0 }
 0x5f9   : > { %v1434_v18 = vsel %vm673_vm1, %v1427_v16, 0.0 }
 0x5fa   : > { %1435 = vadd.xlane.f32.xlu0 %v1434_v18  ;;  %v1429_v19 = vpop.f32.mrf.mxu0 }
 0x5fc   : > { %v2029_v20 = vpop.f32.mrf.mxu0 }
 0x683   : > { %v1436_v21 = vpop.xlane.xlu0 %1435 }
 0x684   : > { %v1438_v22 = vmul.f32 0.015625, %v1436_v21 }
 0x686   : > { %v1439_v23 = vsub.f32 %v1427_v16, %v1438_v22 }
 0x688   : > { %v1440_v24 = vmul.f32 %v1439_v23, %v1439_v23 }
 0x68a   : > { %v1441_v25 = vsel %vm673_vm1, %v1440_v24, 0.0 }
 0x68b   : > { %1442 = vadd.xlane.f32.xlu1 %v1441_v25 }
 0x714   : > { %v1443_v32 = vpop.xlane.xlu1 %1442 }
 0x715   : > { %v1444_v33 = vmul.f32 0.015625, %v1443_v32 }
 0x717   : > { %v1445_v34 = vadd.f32 1e-05, %v1444_v33 }
 0x719   : > { %2206 = vrsqrt.f32 %v1445_v34 }
 0x726   : > { %v2207_v36 = vpop.eup %2206 }
 0x727   : > { %v1447_v37 = vmul.f32 %v2207_v36, %v1439_v23 }
 0x729   : > { %v1454_v39 = vmul.f32 %v1860_v35, %v1447_v37 }
 0x72b   : > { %v1461_v40 = vadd.f32 %v1861_v38, %v1454_v39 }
 0x72d   : > { %v1462_v41 = vadd.f32 %v1461_v40, %v2703_v5  ;;  %v2186_v5 = vld [vmem:[%s2913_s13 + $0x18] sm:$0xff]  }
 0x72e   : > { %2051 = vmatpush3.bf16.msra.mxu0 %v2186_v5 }
 0x72f   : > { %v1463_v42 = vpack.c.bf16 %v1462_v41, %v1462_v41  ;;  %2052 = vmatprep.subr.bf16.mxu0 %v2426_v0 }
 0x731   : > { %2039 = vmatmul.mubr.msk.bf16.vlgmr.msra.gmra.mxu1 %vm673_vm1, %v1463_v42 }
 0x732   : > { %2053 = vmatpush3.bf16.msra.mxu0 %v2187_v45 }
 0x733   : > { %2054 = vmatprep.subr.bf16.mxu0 %v2426_v0 }
 0x736   : > { %2055 = vmatpush3.bf16.msra.mxu0 %v2188_v46 }
 0x737   : > { %2056 = vmatprep.subr.bf16.mxu0 %v2426_v0  ;;  %v1868_v0 = vld [vmem:[#allocation11] ss:$0 sm:$0xff] }
 0x73a   : > { %2057 = vmatpush3.bf16.msra.mxu0 %v2189_v47 }
 0x7f1   : > { %v1540_v49 = vpop.f32.mrf.mxu1 }
 0x7f2   : > { %v1541_v50 = vadd.f32 %v1862_v48, %v1540_v49 }
 0x7f3   : > { %v2040_v51 = vpop.f32.mrf.mxu1 }
 0x7f4   : > { %v1547_v52 = vmul.f32 0.70710677, %v1541_v50  ;;  %v1546_v56 = vmul.f32 0.5, %v1541_v50 }
 0x7f5   : > { %v1543_v53 = vpop.f32.mrf.mxu1 }
 0x7f6   : > { %2208 = verf.f32 %v1547_v52 }
 0x7f7   : > { %v2041_v54 = vpop.f32.mrf.mxu1 }
 0x803   : > { %v2209_v55 = vpop.eup %2208 }
 0x804   : > { %v1549_v57 = vadd.f32 1.0, %v2209_v55 }
 0x806   : > { %v1550_v58 = vmul.f32 %v1549_v57, %v1546_v56 }
 0x808   : > { %v1551_v59 = vpack.c.bf16 %v1550_v58, %v1550_v58 }
 0x80a   : > { %2059 = vmatmul.mubr.bf16.vlgmr.msra.gmra.mxu0 %v1551_v59 }
 0x8ca   : > { %v1657_v60 = vpop.f32.mrf.mxu0 }
 0x8cb   : > { %v1658_v61 = vadd.f32 %v1868_v0, %v1657_v60 }
 0x8cc   : > { %v2060_v62 = vpop.f32.mrf.mxu0 }
 0x8cd   : > { %v1665_v63 = vsel %vm673_vm1, %v1658_v61, 0.0 }
 0x8ce   : > { %1666 = vadd.xlane.f32.xlu0 %v1665_v63  ;;  %v1660_v1 = vpop.f32.mrf.mxu0 }
 0x8d0   : > { %v2061_v2 = vpop.f32.mrf.mxu0 }
 0x957   : > { %v1667_v3 = vpop.xlane.xlu0 %1666 }
 0x958   : > { %v1668_v4 = vmul.f32 0.015625, %v1667_v3 }
 0x95a   : > { %v1669_v6 = vsub.f32 %v1658_v61, %v1668_v4 }
 0x95c   : > { %v1670_v7 = vmul.f32 %v1669_v6, %v1669_v6 }
 0x95e   : > { %v1671_v8 = vsel %vm673_vm1, %v1670_v7, 0.0 }
 0x95f   : > { %1672 = vadd.xlane.f32.xlu0 %v1671_v8 }
 0x9e8   : > { %v1673_v9 = vpop.xlane.xlu0 %1672 }
 0x9e9   : > { %v1674_v10 = vmul.f32 0.015625, %v1673_v9 }
 0x9eb   : > { %v1675_v11 = vadd.f32 1e-05, %v1674_v10 }
 0x9ed   : > { %2210 = vrsqrt.f32 %v1675_v11 }
 0x9fa   : > { %v2211_v12 = vpop.eup %2210 }
 0x9fb   : > { %v1677_v14 = vmul.f32 %v2211_v12, %v1669_v6 }
 0x9fd   : > { %v1684_v16 = vmul.f32 %v1877_v13, %v1677_v14 }
 0x9ff   : > { %v1691_v17 = vadd.f32 %v1878_v15, %v1684_v16 }
 0xa01   : > { %v1692_v18 = vadd.f32 %v1691_v17, %v1462_v41 }
 0xa03   : > { %1693 = vst.msk [vmem:[%s630_s28] sm:$0xff] %vm673_vm1, %v1692_v18 }
 0xa04 PF: > { %p30_p13 = scmp.ge.s32.totalorder %s2619_s22, 4   ;;  %s2955_s24 = smov %s2408_s25 }
 0xa05   : > { %s2956_s25 = smov %s2412_s26  ;;  %s2957_s26 = smov %s2630_s23 }
 0xa06   : > { %s2958_s27 = smov %s2619_s22  ;;  %32 = sbr.rel (!%p30_p13) target bundleno = 16 (0x10), region = 148 }
 0xa0b   :  { %1713 = vsyncpa [#allocation4], 1 }
 0xa0c   :  { %1715 = vsyncpa [#allocation4 + $0x1], 1 }
 0xa0d   :  { %1716 = vsyncpa [#allocation6], 1 }
 0xa0e   :  { %1717 = vsyncpa [#allocation9], 1 }
 0xa0f   :  { %1718 = vsyncpa [#allocation12], 1 }

</bundles_post_ra>
